<compile_context>
chip_gen: v5e
topology: v5e:2x2
jax: 0.10.0
libtpu: 0.0.40
codegen_flags: <defaults>
</compile_context>

<pallas_src>
import jax
import jax.numpy as jnp
import numpy as np
from jax.experimental import pallas as pl
from jax.experimental.pallas import tpu as pltpu

EPS = 1e-5
VMEM_LIMIT = 32 * 1024 * 1024  # safe on v5e/v6e (128 MiB) and v7x (64 MiB)


# ---------------------------------------------------------------------------
# Kernel builders
# ---------------------------------------------------------------------------
def make_conv_call(N, H, W, Ci, Co, fuse_bn_relu, mm_dtype):
    """3x3 SAME conv over one image per grid step, lane layout (H, W*C).

    If fuse_bn_relu: the input is first transformed with y*scale+shift, ReLU
    (the folded BatchNorm + ReLU of the previous conv).
    Outputs:  conv result (N, H, W*Co)  and per-image partial BN statistics
              (N, 2, W*Co) = [sum, sum of squares] over the H rows.
    """
    WCi, WCo = W * Ci, W * Co

    def kernel(*refs):
        if fuse_bn_relu:
            x_ref, s_ref, t_ref, w_ref, y_ref, st_ref, pad_ref = refs
            xin = jnp.maximum(x_ref[0] * s_ref[...] + t_ref[...], 0.0)
        else:
            x_ref, w_ref, y_ref, st_ref, pad_ref = refs
            xin = x_ref[0]

        # Zero only the 1-row halo; W-boundary padding lives in the weights.
        zero_row = jnp.zeros((1, WCi), jnp.float32)
        pad_ref[0:1, :] = zero_row
        pad_ref[H + 1:H + 2, :] = zero_row
        pad_ref[1:H + 1, :] = xin

        # 3 fused MXU matmuls (one per dy tap); dx taps + channel contraction
        # are folded into the banded weight -> no per-patch relayout copies.
        acc = jnp.zeros((H, WCo), jnp.float32)
        for dy in range(3):
            acc = acc + jnp.dot(pad_ref[dy:dy + H, :].astype(mm_dtype),
                                w_ref[dy],
                                preferred_element_type=jnp.float32)
        y_ref[0] = acc

        # Partial BN statistics (per (w, channel) lane; folded over w + batch
        # by tiny XLA ops in the wrapper).
        st_ref[0, 0:1, :] = jnp.sum(acc, axis=0, keepdims=True)
        st_ref[0, 1:2, :] = jnp.sum(acc * acc, axis=0, keepdims=True)

    x_spec = pl.BlockSpec((1, H, WCi), lambda n: (n, 0, 0))
    vec_spec = pl.BlockSpec((1, WCi), lambda n: (0, 0))
    w_spec = pl.BlockSpec((3, WCi, WCo), lambda n: (0, 0, 0))
    in_specs = [x_spec] + ([vec_spec, vec_spec] if fuse_bn_relu else []) + [w_spec]

    return pl.pallas_call(
        kernel,
        grid=(N,),
        in_specs=in_specs,
        out_specs=(pl.BlockSpec((1, H, WCo), lambda n: (n, 0, 0)),
                   pl.BlockSpec((1, 2, WCo), lambda n: (n, 0, 0))),
        out_shape=(jax.ShapeDtypeStruct((N, H, WCo), jnp.float32),
                   jax.ShapeDtypeStruct((N, 2, WCo), jnp.float32)),
        scratch_shapes=[pltpu.VMEM((H + 2, WCi), jnp.float32)],
        compiler_params=pltpu.CompilerParams(
            dimension_semantics=("parallel",),
            vmem_limit_bytes=VMEM_LIMIT),
    )


def make_bn_pool_call(N, H, W, Co):
    """Apply folded BN2 + ReLU, emit encoder activations and 2x2 maxpool."""
    WCo = W * Co
    Hh, Wh = H // 2, W // 2

    def kernel(y_ref, s_ref, t_ref, enc_ref, pool_ref):
        enc = jnp.maximum(y_ref[0] * s_ref[...] + t_ref[...], 0.0)   # (H, W*Co)
        enc_ref[0] = enc
        # 2x2 maxpool via reshape + max (no strided slices).
        em = jnp.max(enc.reshape(Hh, 2, WCo), axis=1)                # H pairs
        em3 = em.reshape(Hh, Wh, 2 * Co)                             # W pairs
        pool = jnp.maximum(em3[:, :, :Co], em3[:, :, Co:])
        pool_ref[0] = pool.reshape(Hh, Wh * Co)

    return pl.pallas_call(
        kernel,
        grid=(N,),
        in_specs=[pl.BlockSpec((1, H, WCo), lambda n: (n, 0, 0)),
                  pl.BlockSpec((1, WCo), lambda n: (0, 0)),
                  pl.BlockSpec((1, WCo), lambda n: (0, 0))],
        out_specs=(pl.BlockSpec((1, H, WCo), lambda n: (n, 0, 0)),
                   pl.BlockSpec((1, Hh, Wh * Co), lambda n: (n, 0, 0))),
        out_shape=(jax.ShapeDtypeStruct((N, H, WCo), jnp.float32),
                   jax.ShapeDtypeStruct((N, Hh, Wh * Co), jnp.float32)),
        compiler_params=pltpu.CompilerParams(
            dimension_semantics=("parallel",),
            vmem_limit_bytes=VMEM_LIMIT),
    )


# ---------------------------------------------------------------------------
# Host-side helpers (tiny XLA glue between kernel passes)
# ---------------------------------------------------------------------------
def _banded_weights(w_oihw, W, dtype):
    """torch (Co, Ci, 3, 3) -> (3, W*Ci, W*Co) banded matrices.

    mats[dy][(w+dx-1)*Ci + ci, w*Co + f] = w_oihw[f, ci, dy, dx] when
    0 <= w+dx-1 < W (taps outside the image are dropped == zero padding in W).
    """
    Co, Ci = w_oihw.shape[0], w_oihw.shape[1]
    k = jnp.transpose(w_oihw, (2, 3, 1, 0)).astype(jnp.float32)   # (3,3,Ci,Co)
    mats = []
    for dy in range(3):
        a = jnp.zeros((W + 2, Ci, W, Co), jnp.float32)
        for dx in range(3):
            shift = jnp.eye(W + 2, W, k=-dx, dtype=jnp.float32)   # [w+dx, w] = 1
            a = a + shift[:, None, :, None] * k[dy, dx][None, :, None, :]
        mats.append(a.reshape((W + 2) * Ci, W * Co)[Ci:(W + 1) * Ci])
    return jnp.stack(mats).astype(dtype)


def _bn_fold(stats, gamma, beta, W, count):
    """Reduce per-image (sum, sumsq) partials -> lane-tiled scale/shift."""
    C = gamma.shape[0]
    s = jnp.sum(stats[:, 0, :], axis=0).reshape(W, C).sum(axis=0)
    q = jnp.sum(stats[:, 1, :], axis=0).reshape(W, C).sum(axis=0)
    mean = s / count
    var = jnp.maximum(q / count - mean * mean, 0.0)    # biased var (train BN)
    scale = gamma * jax.lax.rsqrt(var + EPS)
    shift = beta - mean * scale
    return jnp.tile(scale, W)[None, :], jnp.tile(shift, W)[None, :]


def encoder_block_forward(x_nchw, params, mm_dtype=jnp.float32):
    """Matches encoder_block.forward: returns (encoder_pool, encoder), NCHW.

    mm_dtype=jnp.bfloat16 halves matmul bytes and doubles MXU rate on v6e/v7x
    (loosen comparison tolerance accordingly); default f32 for exactness.
    """
    N, Cin, H, W = x_nchw.shape
    Cf = params['w1'].shape[0]
    assert H % 2 == 0 and W % 2 == 0
    Hh, Wh = H // 2, W // 2
    count = N * H * W

    # NCHW -> lane-packed (N, H, W*Cin). In a full UNet this layout would be
    # kept across stages; the transposes here are only interface plumbing.
    x = jnp.transpose(x_nchw, (0, 2, 3, 1)).astype(jnp.float32).reshape(N, H, W * Cin)

    w1b = _banded_weights(params['w1'], W, mm_dtype)   # (3, W*Cin, W*Cf)
    w2b = _banded_weights(params['w2'], W, mm_dtype)   # (3, W*Cf,  W*Cf)
    # conv biases b1/b2 are intentionally not applied: train-mode BatchNorm
    # subtracts the per-channel batch mean, which cancels them exactly.

    y1, st1 = make_conv_call(N, H, W, Cin, Cf, False, mm_dtype)(x, w1b)
    s1, t1 = _bn_fold(st1, params['g1'], params['be1'], W, count)

    y2, st2 = make_conv_call(N, H, W, Cf, Cf, True, mm_dtype)(y1, s1, t1, w2b)
    s2, t2 = _bn_fold(st2, params['g2'], params['be2'], W, count)

    enc_wc, pool_wc = make_bn_pool_call(N, H, W, Cf)(y2, s2, t2)

    enc = jnp.transpose(enc_wc.reshape(N, H, W, Cf), (0, 3, 1, 2))
    pool = jnp.transpose(pool_wc.reshape(N, Hh, Wh, Cf), (0, 3, 1, 2))
    return pool, enc


# ---------------------------------------------------------------------------
# Pure-JAX reference (mirrors the PyTorch forward, NCHW)
# ---------------------------------------------------------------------------
def ref_forward(x, p):
    def conv(x, w, b):
        y = jax.lax.conv_general_dilated(
            x, w, (1, 1), 'SAME', dimension_numbers=('NCHW', 'OIHW', 'NCHW'),
            precision=jax.lax.Precision.HIGHEST)
        return y + b[None, :, None, None]

    def bn(x, g, be):
        m = jnp.mean(x, axis=(0, 2, 3), keepdims=True)
        v = jnp.mean((x - m) ** 2, axis=(0, 2, 3), keepdims=True)
        return (x - m) / jnp.sqrt(v + EPS) * g[None, :, None, None] + be[None, :, None, None]

    e = jax.nn.relu(bn(conv(x, p['w1'], p['b1']), p['g1'], p['be1']))
    e = jax.nn.relu(bn(conv(e, p['w2'], p['b2']), p['g2'], p['be2']))
    pool = jax.lax.reduce_window(e, -jnp.inf, jax.lax.max,
                                 (1, 1, 2, 2), (1, 1, 2, 2), 'VALID')
    return pool, e


if __name__ == "__main__":
    key = jax.random.PRNGKey(0)
    N, Cin, Cf, H, W = 2, 4, 8, 16, 16
    ks = jax.random.split(key, 5)

    # deterministic synthetic parameters (shapes from encoder_block.__init__)
    params = {
        'w1': jax.random.normal(ks[0], (Cf, Cin, 3, 3), jnp.float32) * 0.2,
        'b1': jax.random.normal(ks[1], (Cf,), jnp.float32) * 0.1,
        'g1': jnp.ones((Cf,), jnp.float32),    # BatchNorm weight init
        'be1': jnp.zeros((Cf,), jnp.float32),  # BatchNorm bias init
        'w2': jax.random.normal(ks[2], (Cf, Cf, 3, 3), jnp.float32) * 0.2,
        'b2': jax.random.normal(ks[3], (Cf,), jnp.float32) * 0.1,
        'g2': jnp.ones((Cf,), jnp.float32),
        'be2': jnp.zeros((Cf,), jnp.float32),
    }
    # TODO(synk): BatchNorm running_mean/running_var updates (training-mode
    # side effect) are not modeled; they do not affect the forward output.

    x = jax.random.normal(ks[4], (N, Cin, H, W), jnp.float32)

    fwd = jax.jit(lambda xx: encoder_block_forward(xx, params))
    pool, enc = jax.block_until_ready(fwd(x))
    pool_r, enc_r = ref_forward(x, params)

    assert pool.shape == (N, Cf, H // 2, W // 2)
    assert enc.shape == (N, Cf, H, W)
    np.testing.assert_allclose(np.asarray(enc), np.asarray(enc_r), atol=1e-3, rtol=1e-3)
    np.testing.assert_allclose(np.asarray(pool), np.asarray(pool_r), atol=1e-3, rtol=1e-3)
    print("KERNEL_OK")
</pallas_src>

<mosaic_0001>
module attributes {stable_mosaic.version = 11 : i64} {
  func.func @kernel(%arg0: i32, %arg1: memref<1x16x64xf32, #tpu.memory_space<vmem>>, %arg2: memref<3x64x128xf32, #tpu.memory_space<vmem>>, %arg3: memref<1x16x128xf32, #tpu.memory_space<vmem>>, %arg4: memref<1x2x128xf32, #tpu.memory_space<vmem>>, %arg5: memref<18x64xf32, #tpu.memory_space<vmem>>) attributes {dimension_semantics = [#tpu.dimension_semantics<parallel>], iteration_bounds = array<i64: 2>, scalar_prefetch = 0 : i64, scratch_operands = 1 : i64, tpu.core_type = #tpu.core_type<tc>, window_params = [{transform_indices = @transform_0, window_bounds = array<i64: 1, 16, 64>}, {pipeline_mode = #tpu.pipeline_mode<synchronous>, transform_indices = @transform_1, window_bounds = array<i64: 3, 64, 128>}, {transform_indices = @transform_2, window_bounds = array<i64: 1, 16, 128>}, {transform_indices = @transform_3, window_bounds = array<i64: 1, 2, 128>}]} {
    %c0 = arith.constant 0 : index
    %c0_0 = arith.constant 0 : index
    %c0_1 = arith.constant 0 : index
    %0 = vector.load %arg1[%c0, %c0_0, %c0_1] : memref<1x16x64xf32, #tpu.memory_space<vmem>>, vector<1x16x64xf32>
    %1 = vector.shape_cast %0 : vector<1x16x64xf32> to vector<16x64xf32>
    %cst = arith.constant 0.000000e+00 : f32
    %2 = vector.broadcast %cst : f32 to vector<1x64xf32>
    %c0_2 = arith.constant 0 : index
    %c0_3 = arith.constant 0 : index
    %3 = vector.load %arg5[%c0_2, %c0_3] : memref<18x64xf32, #tpu.memory_space<vmem>>, vector<1x64xf32>
    tpu.vector_store %arg5[%c0_2, %c0_3], %2 {strides = array<i32>} : memref<18x64xf32, #tpu.memory_space<vmem>>, vector<1x64xf32>,
    %c17 = arith.constant 17 : index
    %c0_4 = arith.constant 0 : index
    %4 = vector.load %arg5[%c17, %c0_4] : memref<18x64xf32, #tpu.memory_space<vmem>>, vector<1x64xf32>
    tpu.vector_store %arg5[%c17, %c0_4], %2 {strides = array<i32>} : memref<18x64xf32, #tpu.memory_space<vmem>>, vector<1x64xf32>,
    %c1 = arith.constant 1 : index
    %c0_5 = arith.constant 0 : index
    %5 = vector.load %arg5[%c1, %c0_5] : memref<18x64xf32, #tpu.memory_space<vmem>>, vector<16x64xf32>
    tpu.vector_store %arg5[%c1, %c0_5], %1 {strides = array<i32>} : memref<18x64xf32, #tpu.memory_space<vmem>>, vector<16x64xf32>,
    %cst_6 = arith.constant 0.000000e+00 : f32
    %6 = vector.broadcast %cst_6 : f32 to vector<16x128xf32>
    %c0_7 = arith.constant 0 : index
    %c0_8 = arith.constant 0 : index
    %7 = vector.load %arg5[%c0_7, %c0_8] : memref<18x64xf32, #tpu.memory_space<vmem>>, vector<16x64xf32>
    %c0_9 = arith.constant 0 : index
    %c0_10 = arith.constant 0 : index
    %c0_11 = arith.constant 0 : index
    %8 = vector.load %arg2[%c0_9, %c0_10, %c0_11] : memref<3x64x128xf32, #tpu.memory_space<vmem>>, vector<1x64x128xf32>
    %9 = vector.shape_cast %8 : vector<1x64x128xf32> to vector<64x128xf32>
    %cst_12 = arith.constant dense<0.000000e+00> : vector<16x128xf32>
    %10 = tpu.matmul %7, %9, %cst_12 {dimension_numbers = #tpu.dot_dimension_numbers<[1], [0], [0], [1], [0, 0, 1, 1], [], []>} : vector<16x64xf32>, vector<64x128xf32>, vector<16x128xf32> -> vector<16x128xf32>
    %11 = arith.addf %6, %10 : vector<16x128xf32>
    %c1_13 = arith.constant 1 : index
    %c0_14 = arith.constant 0 : index
    %12 = vector.load %arg5[%c1_13, %c0_14] : memref<18x64xf32, #tpu.memory_space<vmem>>, vector<16x64xf32>
    %c1_15 = arith.constant 1 : index
    %c0_16 = arith.constant 0 : index
    %c0_17 = arith.constant 0 : index
    %13 = vector.load %arg2[%c1_15, %c0_16, %c0_17] : memref<3x64x128xf32, #tpu.memory_space<vmem>>, vector<1x64x128xf32>
    %14 = vector.shape_cast %13 : vector<1x64x128xf32> to vector<64x128xf32>
    %cst_18 = arith.constant dense<0.000000e+00> : vector<16x128xf32>
    %15 = tpu.matmul %12, %14, %cst_18 {dimension_numbers = #tpu.dot_dimension_numbers<[1], [0], [0], [1], [0, 0, 1, 1], [], []>} : vector<16x64xf32>, vector<64x128xf32>, vector<16x128xf32> -> vector<16x128xf32>
    %16 = arith.addf %11, %15 : vector<16x128xf32>
    %c2 = arith.constant 2 : index
    %c0_19 = arith.constant 0 : index
    %17 = vector.load %arg5[%c2, %c0_19] : memref<18x64xf32, #tpu.memory_space<vmem>>, vector<16x64xf32>
    %c2_20 = arith.constant 2 : index
    %c0_21 = arith.constant 0 : index
    %c0_22 = arith.constant 0 : index
    %18 = vector.load %arg2[%c2_20, %c0_21, %c0_22] : memref<3x64x128xf32, #tpu.memory_space<vmem>>, vector<1x64x128xf32>
    %19 = vector.shape_cast %18 : vector<1x64x128xf32> to vector<64x128xf32>
    %cst_23 = arith.constant dense<0.000000e+00> : vector<16x128xf32>
    %20 = tpu.matmul %17, %19, %cst_23 {dimension_numbers = #tpu.dot_dimension_numbers<[1], [0], [0], [1], [0, 0, 1, 1], [], []>} : vector<16x64xf32>, vector<64x128xf32>, vector<16x128xf32> -> vector<16x128xf32>
    %21 = arith.addf %16, %20 : vector<16x128xf32>
    %c0_24 = arith.constant 0 : index
    %c0_25 = arith.constant 0 : index
    %c0_26 = arith.constant 0 : index
    %22 = vector.load %arg3[%c0_24, %c0_25, %c0_26] : memref<1x16x128xf32, #tpu.memory_space<vmem>>, vector<1x16x128xf32>
    %23 = vector.shape_cast %22 : vector<1x16x128xf32> to vector<16x128xf32>
    %24 = vector.shape_cast %21 : vector<16x128xf32> to vector<1x16x128xf32>
    tpu.vector_store %arg3[%c0_24, %c0_25, %c0_26], %24 {strides = array<i32>} : memref<1x16x128xf32, #tpu.memory_space<vmem>>, vector<1x16x128xf32>,
    %cst_27 = arith.constant dense<0.000000e+00> : vector<128xf32>
    %25 = vector.multi_reduction <add>, %21, %cst_27 [0] : vector<16x128xf32> to vector<128xf32>
    %26 = vector.shape_cast %25 : vector<128xf32> to vector<1x128xf32>
    %c0_28 = arith.constant 0 : index
    %c0_29 = arith.constant 0 : index
    %c0_30 = arith.constant 0 : index
    %27 = vector.load %arg4[%c0_28, %c0_29, %c0_30] : memref<1x2x128xf32, #tpu.memory_space<vmem>>, vector<1x1x128xf32>
    %28 = vector.shape_cast %27 : vector<1x1x128xf32> to vector<1x128xf32>
    %29 = vector.shape_cast %26 : vector<1x128xf32> to vector<1x1x128xf32>
    tpu.vector_store %arg4[%c0_28, %c0_29, %c0_30], %29 {strides = array<i32>} : memref<1x2x128xf32, #tpu.memory_space<vmem>>, vector<1x1x128xf32>,
    %30 = arith.mulf %21, %21 : vector<16x128xf32>
    %cst_31 = arith.constant dense<0.000000e+00> : vector<128xf32>
    %31 = vector.multi_reduction <add>, %30, %cst_31 [0] : vector<16x128xf32> to vector<128xf32>
    %32 = vector.shape_cast %31 : vector<128xf32> to vector<1x128xf32>
    %c0_32 = arith.constant 0 : index
    %c1_33 = arith.constant 1 : index
    %c0_34 = arith.constant 0 : index
    %33 = vector.load %arg4[%c0_32, %c1_33, %c0_34] : memref<1x2x128xf32, #tpu.memory_space<vmem>>, vector<1x1x128xf32>
    %34 = vector.shape_cast %33 : vector<1x1x128xf32> to vector<1x128xf32>
    %35 = vector.shape_cast %32 : vector<1x128xf32> to vector<1x1x128xf32>
    tpu.vector_store %arg4[%c0_32, %c1_33, %c0_34], %35 {strides = array<i32>} : memref<1x2x128xf32, #tpu.memory_space<vmem>>, vector<1x1x128xf32>,
    return
  }
  func.func @transform_0(%arg0: i32) -> (i32, i32, i32) {
    %c0_i32 = arith.constant 0 : i32
    %c0_i32_0 = arith.constant 0 : i32
    %c0_i32_1 = arith.constant 0 : i32
    return %arg0, %c0_i32, %c0_i32_0 : i32, i32, i32
  }
  func.func @transform_1(%arg0: i32) -> (i32, i32, i32) {
    %c0_i32 = arith.constant 0 : i32
    %c0_i32_0 = arith.constant 0 : i32
    %c0_i32_1 = arith.constant 0 : i32
    %c0_i32_2 = arith.constant 0 : i32
    return %c0_i32, %c0_i32_0, %c0_i32_1 : i32, i32, i32
  }
  func.func @transform_2(%arg0: i32) -> (i32, i32, i32) {
    %c0_i32 = arith.constant 0 : i32
    %c0_i32_0 = arith.constant 0 : i32
    %c0_i32_1 = arith.constant 0 : i32
    return %arg0, %c0_i32, %c0_i32_0 : i32, i32, i32
  }
  func.func @transform_3(%arg0: i32) -> (i32, i32, i32) {
    %c0_i32 = arith.constant 0 : i32
    %c0_i32_0 = arith.constant 0 : i32
    %c0_i32_1 = arith.constant 0 : i32
    return %arg0, %c0_i32, %c0_i32_0 : i32, i32, i32
  }
}

module attributes {stable_mosaic.version = 11 : i64} {
  func.func @kernel(%arg0: i32, %arg1: memref<1x16x128xf32, #tpu.memory_space<vmem>>, %arg2: memref<1x128xf32, #tpu.memory_space<vmem>>, %arg3: memref<1x128xf32, #tpu.memory_space<vmem>>, %arg4: memref<3x128x128xf32, #tpu.memory_space<vmem>>, %arg5: memref<1x16x128xf32, #tpu.memory_space<vmem>>, %arg6: memref<1x2x128xf32, #tpu.memory_space<vmem>>, %arg7: memref<18x128xf32, #tpu.memory_space<vmem>>) attributes {dimension_semantics = [#tpu.dimension_semantics<parallel>], iteration_bounds = array<i64: 2>, scalar_prefetch = 0 : i64, scratch_operands = 1 : i64, tpu.core_type = #tpu.core_type<tc>, window_params = [{transform_indices = @transform_0, window_bounds = array<i64: 1, 16, 128>}, {pipeline_mode = #tpu.pipeline_mode<synchronous>, transform_indices = @transform_1, window_bounds = array<i64: 1, 128>}, {pipeline_mode = #tpu.pipeline_mode<synchronous>, transform_indices = @transform_2, window_bounds = array<i64: 1, 128>}, {pipeline_mode = #tpu.pipeline_mode<synchronous>, transform_indices = @transform_3, window_bounds = array<i64: 3, 128, 128>}, {transform_indices = @transform_4, window_bounds = array<i64: 1, 16, 128>}, {transform_indices = @transform_5, window_bounds = array<i64: 1, 2, 128>}]} {
    %c0 = arith.constant 0 : index
    %c0_0 = arith.constant 0 : index
    %c0_1 = arith.constant 0 : index
    %0 = vector.load %arg1[%c0, %c0_0, %c0_1] : memref<1x16x128xf32, #tpu.memory_space<vmem>>, vector<1x16x128xf32>
    %1 = vector.shape_cast %0 : vector<1x16x128xf32> to vector<16x128xf32>
    %c0_2 = arith.constant 0 : index
    %c0_3 = arith.constant 0 : index
    %2 = vector.load %arg2[%c0_2, %c0_3] : memref<1x128xf32, #tpu.memory_space<vmem>>, vector<1x128xf32>
    %3 = vector.broadcast %2 : vector<1x128xf32> to vector<16x128xf32>
    %4 = arith.mulf %1, %3 : vector<16x128xf32>
    %c0_4 = arith.constant 0 : index
    %c0_5 = arith.constant 0 : index
    %5 = vector.load %arg3[%c0_4, %c0_5] : memref<1x128xf32, #tpu.memory_space<vmem>>, vector<1x128xf32>
    %6 = vector.broadcast %5 : vector<1x128xf32> to vector<16x128xf32>
    %7 = arith.addf %4, %6 : vector<16x128xf32>
    %cst = arith.constant 0.000000e+00 : f32
    %8 = vector.broadcast %cst : f32 to vector<16x128xf32>
    %9 = arith.maximumf %7, %8 : vector<16x128xf32>
    %cst_6 = arith.constant 0.000000e+00 : f32
    %10 = vector.broadcast %cst_6 : f32 to vector<1x128xf32>
    %c0_7 = arith.constant 0 : index
    %c0_8 = arith.constant 0 : index
    %11 = vector.load %arg7[%c0_7, %c0_8] : memref<18x128xf32, #tpu.memory_space<vmem>>, vector<1x128xf32>
    tpu.vector_store %arg7[%c0_7, %c0_8], %10 {strides = array<i32>} : memref<18x128xf32, #tpu.memory_space<vmem>>, vector<1x128xf32>,
    %c17 = arith.constant 17 : index
    %c0_9 = arith.constant 0 : index
    %12 = vector.load %arg7[%c17, %c0_9] : memref<18x128xf32, #tpu.memory_space<vmem>>, vector<1x128xf32>
    tpu.vector_store %arg7[%c17, %c0_9], %10 {strides = array<i32>} : memref<18x128xf32, #tpu.memory_space<vmem>>, vector<1x128xf32>,
    %c1 = arith.constant 1 : index
    %c0_10 = arith.constant 0 : index
    %13 = vector.load %arg7[%c1, %c0_10] : memref<18x128xf32, #tpu.memory_space<vmem>>, vector<16x128xf32>
    tpu.vector_store %arg7[%c1, %c0_10], %9 {strides = array<i32>} : memref<18x128xf32, #tpu.memory_space<vmem>>, vector<16x128xf32>,
    %cst_11 = arith.constant 0.000000e+00 : f32
    %14 = vector.broadcast %cst_11 : f32 to vector<16x128xf32>
    %c0_12 = arith.constant 0 : index
    %c0_13 = arith.constant 0 : index
    %15 = vector.load %arg7[%c0_12, %c0_13] : memref<18x128xf32, #tpu.memory_space<vmem>>, vector<16x128xf32>
    %c0_14 = arith.constant 0 : index
    %c0_15 = arith.constant 0 : index
    %c0_16 = arith.constant 0 : index
    %16 = vector.load %arg4[%c0_14, %c0_15, %c0_16] : memref<3x128x128xf32, #tpu.memory_space<vmem>>, vector<1x128x128xf32>
    %17 = vector.shape_cast %16 : vector<1x128x128xf32> to vector<128x128xf32>
    %cst_17 = arith.constant dense<0.000000e+00> : vector<16x128xf32>
    %18 = tpu.matmul %15, %17, %cst_17 {dimension_numbers = #tpu.dot_dimension_numbers<[1], [0], [0], [1], [0, 0, 1, 1], [], []>} : vector<16x128xf32>, vector<128x128xf32>, vector<16x128xf32> -> vector<16x128xf32>
    %19 = arith.addf %14, %18 : vector<16x128xf32>
    %c1_18 = arith.constant 1 : index
    %c0_19 = arith.constant 0 : index
    %20 = vector.load %arg7[%c1_18, %c0_19] : memref<18x128xf32, #tpu.memory_space<vmem>>, vector<16x128xf32>
    %c1_20 = arith.constant 1 : index
    %c0_21 = arith.constant 0 : index
    %c0_22 = arith.constant 0 : index
    %21 = vector.load %arg4[%c1_20, %c0_21, %c0_22] : memref<3x128x128xf32, #tpu.memory_space<vmem>>, vector<1x128x128xf32>
    %22 = vector.shape_cast %21 : vector<1x128x128xf32> to vector<128x128xf32>
    %cst_23 = arith.constant dense<0.000000e+00> : vector<16x128xf32>
    %23 = tpu.matmul %20, %22, %cst_23 {dimension_numbers = #tpu.dot_dimension_numbers<[1], [0], [0], [1], [0, 0, 1, 1], [], []>} : vector<16x128xf32>, vector<128x128xf32>, vector<16x128xf32> -> vector<16x128xf32>
    %24 = arith.addf %19, %23 : vector<16x128xf32>
    %c2 = arith.constant 2 : index
    %c0_24 = arith.constant 0 : index
    %25 = vector.load %arg7[%c2, %c0_24] : memref<18x128xf32, #tpu.memory_space<vmem>>, vector<16x128xf32>
    %c2_25 = arith.constant 2 : index
    %c0_26 = arith.constant 0 : index
    %c0_27 = arith.constant 0 : index
    %26 = vector.load %arg4[%c2_25, %c0_26, %c0_27] : memref<3x128x128xf32, #tpu.memory_space<vmem>>, vector<1x128x128xf32>
    %27 = vector.shape_cast %26 : vector<1x128x128xf32> to vector<128x128xf32>
    %cst_28 = arith.constant dense<0.000000e+00> : vector<16x128xf32>
    %28 = tpu.matmul %25, %27, %cst_28 {dimension_numbers = #tpu.dot_dimension_numbers<[1], [0], [0], [1], [0, 0, 1, 1], [], []>} : vector<16x128xf32>, vector<128x128xf32>, vector<16x128xf32> -> vector<16x128xf32>
    %29 = arith.addf %24, %28 : vector<16x128xf32>
    %c0_29 = arith.constant 0 : index
    %c0_30 = arith.constant 0 : index
    %c0_31 = arith.constant 0 : index
    %30 = vector.load %arg5[%c0_29, %c0_30, %c0_31] : memref<1x16x128xf32, #tpu.memory_space<vmem>>, vector<1x16x128xf32>
    %31 = vector.shape_cast %30 : vector<1x16x128xf32> to vector<16x128xf32>
    %32 = vector.shape_cast %29 : vector<16x128xf32> to vector<1x16x128xf32>
    tpu.vector_store %arg5[%c0_29, %c0_30, %c0_31], %32 {strides = array<i32>} : memref<1x16x128xf32, #tpu.memory_space<vmem>>, vector<1x16x128xf32>,
    %cst_32 = arith.constant dense<0.000000e+00> : vector<128xf32>
    %33 = vector.multi_reduction <add>, %29, %cst_32 [0] : vector<16x128xf32> to vector<128xf32>
    %34 = vector.shape_cast %33 : vector<128xf32> to vector<1x128xf32>
    %c0_33 = arith.constant 0 : index
    %c0_34 = arith.constant 0 : index
    %c0_35 = arith.constant 0 : index
    %35 = vector.load %arg6[%c0_33, %c0_34, %c0_35] : memref<1x2x128xf32, #tpu.memory_space<vmem>>, vector<1x1x128xf32>
    %36 = vector.shape_cast %35 : vector<1x1x128xf32> to vector<1x128xf32>
    %37 = vector.shape_cast %34 : vector<1x128xf32> to vector<1x1x128xf32>
    tpu.vector_store %arg6[%c0_33, %c0_34, %c0_35], %37 {strides = array<i32>} : memref<1x2x128xf32, #tpu.memory_space<vmem>>, vector<1x1x128xf32>,
    %38 = arith.mulf %29, %29 : vector<16x128xf32>
    %cst_36 = arith.constant dense<0.000000e+00> : vector<128xf32>
    %39 = vector.multi_reduction <add>, %38, %cst_36 [0] : vector<16x128xf32> to vector<128xf32>
    %40 = vector.shape_cast %39 : vector<128xf32> to vector<1x128xf32>
    %c0_37 = arith.constant 0 : index
    %c1_38 = arith.constant 1 : index
    %c0_39 = arith.constant 0 : index
    %41 = vector.load %arg6[%c0_37, %c1_38, %c0_39] : memref<1x2x128xf32, #tpu.memory_space<vmem>>, vector<1x1x128xf32>
    %42 = vector.shape_cast %41 : vector<1x1x128xf32> to vector<1x128xf32>
    %43 = vector.shape_cast %40 : vector<1x128xf32> to vector<1x1x128xf32>
    tpu.vector_store %arg6[%c0_37, %c1_38, %c0_39], %43 {strides = array<i32>} : memref<1x2x128xf32, #tpu.memory_space<vmem>>, vector<1x1x128xf32>,
    return
  }
  func.func @transform_0(%arg0: i32) -> (i32, i32, i32) {
    %c0_i32 = arith.constant 0 : i32
    %c0_i32_0 = arith.constant 0 : i32
    %c0_i32_1 = arith.constant 0 : i32
    return %arg0, %c0_i32, %c0_i32_0 : i32, i32, i32
  }
  func.func @transform_1(%arg0: i32) -> (i32, i32) {
    %c0_i32 = arith.constant 0 : i32
    %c0_i32_0 = arith.constant 0 : i32
    %c0_i32_1 = arith.constant 0 : i32
    return %c0_i32, %c0_i32_0 : i32, i32
  }
  func.func @transform_2(%arg0: i32) -> (i32, i32) {
    %c0_i32 = arith.constant 0 : i32
    %c0_i32_0 = arith.constant 0 : i32
    %c0_i32_1 = arith.constant 0 : i32
    return %c0_i32, %c0_i32_0 : i32, i32
  }
  func.func @transform_3(%arg0: i32) -> (i32, i32, i32) {
    %c0_i32 = arith.constant 0 : i32
    %c0_i32_0 = arith.constant 0 : i32
    %c0_i32_1 = arith.constant 0 : i32
    %c0_i32_2 = arith.constant 0 : i32
    return %c0_i32, %c0_i32_0, %c0_i32_1 : i32, i32, i32
  }
  func.func @transform_4(%arg0: i32) -> (i32, i32, i32) {
    %c0_i32 = arith.constant 0 : i32
    %c0_i32_0 = arith.constant 0 : i32
    %c0_i32_1 = arith.constant 0 : i32
    return %arg0, %c0_i32, %c0_i32_0 : i32, i32, i32
  }
  func.func @transform_5(%arg0: i32) -> (i32, i32, i32) {
    %c0_i32 = arith.constant 0 : i32
    %c0_i32_0 = arith.constant 0 : i32
    %c0_i32_1 = arith.constant 0 : i32
    return %arg0, %c0_i32, %c0_i32_0 : i32, i32, i32
  }
}

module attributes {stable_mosaic.version = 11 : i64} {
  func.func @kernel(%arg0: i32, %arg1: memref<1x16x128xf32, #tpu.memory_space<vmem>>, %arg2: memref<1x128xf32, #tpu.memory_space<vmem>>, %arg3: memref<1x128xf32, #tpu.memory_space<vmem>>, %arg4: memref<1x16x128xf32, #tpu.memory_space<vmem>>, %arg5: memref<1x8x64xf32, #tpu.memory_space<vmem>>) attributes {dimension_semantics = [#tpu.dimension_semantics<parallel>], iteration_bounds = array<i64: 2>, scalar_prefetch = 0 : i64, scratch_operands = 0 : i64, tpu.core_type = #tpu.core_type<tc>, window_params = [{transform_indices = @transform_0, window_bounds = array<i64: 1, 16, 128>}, {pipeline_mode = #tpu.pipeline_mode<synchronous>, transform_indices = @transform_1, window_bounds = array<i64: 1, 128>}, {pipeline_mode = #tpu.pipeline_mode<synchronous>, transform_indices = @transform_2, window_bounds = array<i64: 1, 128>}, {transform_indices = @transform_3, window_bounds = array<i64: 1, 16, 128>}, {transform_indices = @transform_4, window_bounds = array<i64: 1, 8, 64>}]} {
    %c0 = arith.constant 0 : index
    %c0_0 = arith.constant 0 : index
    %c0_1 = arith.constant 0 : index
    %0 = vector.load %arg1[%c0, %c0_0, %c0_1] : memref<1x16x128xf32, #tpu.memory_space<vmem>>, vector<1x16x128xf32>
    %1 = vector.shape_cast %0 : vector<1x16x128xf32> to vector<16x128xf32>
    %c0_2 = arith.constant 0 : index
    %c0_3 = arith.constant 0 : index
    %2 = vector.load %arg2[%c0_2, %c0_3] : memref<1x128xf32, #tpu.memory_space<vmem>>, vector<1x128xf32>
    %3 = vector.broadcast %2 : vector<1x128xf32> to vector<16x128xf32>
    %4 = arith.mulf %1, %3 : vector<16x128xf32>
    %c0_4 = arith.constant 0 : index
    %c0_5 = arith.constant 0 : index
    %5 = vector.load %arg3[%c0_4, %c0_5] : memref<1x128xf32, #tpu.memory_space<vmem>>, vector<1x128xf32>
    %6 = vector.broadcast %5 : vector<1x128xf32> to vector<16x128xf32>
    %7 = arith.addf %4, %6 : vector<16x128xf32>
    %cst = arith.constant 0.000000e+00 : f32
    %8 = vector.broadcast %cst : f32 to vector<16x128xf32>
    %9 = arith.maximumf %7, %8 : vector<16x128xf32>
    %c0_6 = arith.constant 0 : index
    %c0_7 = arith.constant 0 : index
    %c0_8 = arith.constant 0 : index
    %10 = vector.load %arg4[%c0_6, %c0_7, %c0_8] : memref<1x16x128xf32, #tpu.memory_space<vmem>>, vector<1x16x128xf32>
    %11 = vector.shape_cast %10 : vector<1x16x128xf32> to vector<16x128xf32>
    %12 = vector.shape_cast %9 : vector<16x128xf32> to vector<1x16x128xf32>
    tpu.vector_store %arg4[%c0_6, %c0_7, %c0_8], %12 {strides = array<i32>} : memref<1x16x128xf32, #tpu.memory_space<vmem>>, vector<1x16x128xf32>,
    %13 = vector.shape_cast %9 : vector<16x128xf32> to vector<8x2x128xf32>
    %cst_9 = arith.constant dense<0xFF800000> : vector<8x128xf32>
    %14 = vector.multi_reduction <maximumf>, %13, %cst_9 [1] : vector<8x2x128xf32> to vector<8x128xf32>
    %15 = vector.shape_cast %14 : vector<8x128xf32> to vector<8x8x16xf32>
    %16 = vector.extract_strided_slice %15 {offsets = [0, 0, 0], sizes = [8, 8, 8], strides = [1, 1, 1]} : vector<8x8x16xf32> to vector<8x8x8xf32>
    %17 = vector.extract_strided_slice %15 {offsets = [0, 0, 8], sizes = [8, 8, 8], strides = [1, 1, 1]} : vector<8x8x16xf32> to vector<8x8x8xf32>
    %18 = arith.maximumf %16, %17 : vector<8x8x8xf32>
    %19 = vector.shape_cast %18 : vector<8x8x8xf32> to vector<8x64xf32>
    %c0_10 = arith.constant 0 : index
    %c0_11 = arith.constant 0 : index
    %c0_12 = arith.constant 0 : index
    %20 = vector.load %arg5[%c0_10, %c0_11, %c0_12] : memref<1x8x64xf32, #tpu.memory_space<vmem>>, vector<1x8x64xf32>
    %21 = vector.shape_cast %20 : vector<1x8x64xf32> to vector<8x64xf32>
    %22 = vector.shape_cast %19 : vector<8x64xf32> to vector<1x8x64xf32>
    tpu.vector_store %arg5[%c0_10, %c0_11, %c0_12], %22 {strides = array<i32>} : memref<1x8x64xf32, #tpu.memory_space<vmem>>, vector<1x8x64xf32>,
    return
  }
  func.func @transform_0(%arg0: i32) -> (i32, i32, i32) {
    %c0_i32 = arith.constant 0 : i32
    %c0_i32_0 = arith.constant 0 : i32
    %c0_i32_1 = arith.constant 0 : i32
    return %arg0, %c0_i32, %c0_i32_0 : i32, i32, i32
  }
  func.func @transform_1(%arg0: i32) -> (i32, i32) {
    %c0_i32 = arith.constant 0 : i32
    %c0_i32_0 = arith.constant 0 : i32
    %c0_i32_1 = arith.constant 0 : i32
    return %c0_i32, %c0_i32_0 : i32, i32
  }
  func.func @transform_2(%arg0: i32) -> (i32, i32) {
    %c0_i32 = arith.constant 0 : i32
    %c0_i32_0 = arith.constant 0 : i32
    %c0_i32_1 = arith.constant 0 : i32
    return %c0_i32, %c0_i32_0 : i32, i32
  }
  func.func @transform_3(%arg0: i32) -> (i32, i32, i32) {
    %c0_i32 = arith.constant 0 : i32
    %c0_i32_0 = arith.constant 0 : i32
    %c0_i32_1 = arith.constant 0 : i32
    return %arg0, %c0_i32, %c0_i32_0 : i32, i32, i32
  }
  func.func @transform_4(%arg0: i32) -> (i32, i32, i32) {
    %c0_i32 = arith.constant 0 : i32
    %c0_i32_0 = arith.constant 0 : i32
    %c0_i32_1 = arith.constant 0 : i32
    return %arg0, %c0_i32, %c0_i32_0 : i32, i32, i32
  }
}

</mosaic_0001>

<bundles_post_ra>
// kernel: tile.28
= control target key start
LH: loop header
LB: loop body
LE: loop exit
PB: predicated region body
PF: predicated region fallthrough
CT: control target
= control target key end

     0   :  { %s28_s0 = inlined_call_operand.vmem [shape: f32[8], index: 0, kind: input, shape index: {}]   ;;  %s29_s1 = inlined_call_operand.vmem [shape: f32[16,8], index: 1, kind: output, shape index: {}]  }
   0x1   :  { %v4_v0 = vld [vmem:[%s28_s0] ss:$0 sm:$0xff] }
   0x2   :  { %5 = vst [vmem:[%s29_s1] sm:$0xff] %v4_v0 }
   0x3   :  { %8 = vst [vmem:[%s29_s1 + $0x8] sm:$0xff] %v4_v0 }

// kernel: tile.29
= control target key start
LH: loop header
LB: loop body
LE: loop exit
PB: predicated region body
PF: predicated region fallthrough
CT: control target
= control target key end

     0   :  { %s131_s10 = smov 120   ;;  %s132_s11 = smov 104   ;;  %vm3_vm0 = vcmask 64512   ;;  %vm9_vm1 = vcmask 1048512   ;;  %vm15_vm2 = vcmask 982912   ;;  %vm21_vm3 = vcmask 917312   ;;  %s207_s0 = inlined_call_operand.vmem [shape: f32[16,8], index: 0, kind: input, shape index: {}]   ;;  %s208_s1 = inlined_call_operand.vmem [shape: f32[1,128], index: 1, kind: output, shape index: {}]  }
   0x1   :  { %v101_v0 = vld [vmem:[%s207_s0 + $0xf] sm:$0x1]   ;;  %v103_v1 = vld [vmem:[%s207_s0 + $0xd] sm:$0x1]   ;;  %v105_v2 = vld [vmem:[%s207_s0 + $0xb] sm:$0x1]  }
   0x2   :  { %7 = vrot.lane.b32.xlu0 %v101_v0, %s131_s10  ;;  %19 = vrot.lane.b32.xlu1 %v103_v1, %s132_s11  ;;  %s133_s14 = smov 88   ;;  %v102_v3 = vld [vmem:[%s207_s0 + $0xe] sm:$0x1]   ;;  %v104_v4 = vld [vmem:[%s207_s0 + $0xc] sm:$0x1]   ;;  %s134_s19 = smov 112  }
   0x3   :  { %31 = vrot.lane.b32.xlu2 %v105_v2, %s133_s14  ;;  %s135_s20 = smov 96   ;;  %v106_v5 = vld [vmem:[%s207_s0 + $0xa] sm:$0x1]   ;;  %s136_s23 = smov 80   ;;  %v107_v6 = vld [vmem:[%s207_s0 + $0x9] sm:$0x1]  }
   0x4   :  { %v108_v7 = vld [vmem:[%s207_s0 + $0x8] sm:$0x1]   ;;  %s137_s28 = smov 72   ;;  %s138_s29 = smov 64   ;;  %v109_v8 = vld [vmem:[%s207_s0 + $0x7] sm:$0x1]  }
   0x5   :  { %s139_s3 = smov 56   ;;  %v110_v9 = vld [vmem:[%s207_s0 + $0x6] sm:$0x1]   ;;  %v111_v10 = vld [vmem:[%s207_s0 + $0x5] sm:$0x1]   ;;  %s140_s8 = smov 48  }
   0x6   :  { %s141_s9 = smov 40   ;;  %v112_v11 = vld [vmem:[%s207_s0 + $0x4] sm:$0x1]   ;;  %s142_s12 = smov 32   ;;  %v113_v12 = vld [vmem:[%s207_s0 + $0x3] sm:$0x1]  }
   0x7   :  { %v114_v13 = vld [vmem:[%s207_s0 + $0x2] sm:$0x1]   ;;  %s143_s17 = smov 24   ;;  %s144_s18 = smov 16   ;;  %v115_v14 = vld [vmem:[%s207_s0 + $0x1] sm:$0x1]  }
   0x8   :  { %s145_s21 = smov 8   ;;  %v2_v15 = vld [vmem:[%s207_s0] sm:$0x1]   ;;  %vm27_vm4 = vcmask 851712   ;;  %vm33_vm5 = vcmask 786112   ;;  %vm39_vm6 = vcmask 720512  }
   0x9   :  { %4 = vst.msk [vmem:[#allocation0] sm:$0x1] %vm3_vm0, %v2_v15   ;;  %vm45_vm7 = vcmask 654912   ;;  %vm51_vm8 = vcmask 589312   ;;  %vm57_vm9 = vcmask 523712   ;;  %vm63_vm10 = vcmask 458112  }
   0xa   :  { %13 = vrot.lane.b32.xlu0 %v102_v3, %s134_s19  ;;  %25 = vrot.lane.b32.xlu1 %v104_v4, %s135_s20  ;;  %vm69_vm11 = vcmask 392512   ;;  %vm75_vm12 = vcmask 326912   ;;  %vm81_vm13 = vcmask 261312   ;;  %vm87_vm14 = vcmask 195712  }
   0xb   :  { %37 = vrot.lane.b32.xlu2 %v106_v5, %s136_s23  ;;  %vm93_vm15 = vcmask 130112  }
  0x12   :  { %43 = vrot.lane.b32.xlu0 %v107_v6, %s137_s28  ;;  %49 = vrot.lane.b32.xlu1 %v108_v7, %s138_s29 }
  0x13   :  { %55 = vrot.lane.b32.xlu2 %v109_v8, %s139_s3 }
  0x1a   :  { %61 = vrot.lane.b32.xlu0 %v110_v9, %s140_s8  ;;  %67 = vrot.lane.b32.xlu1 %v111_v10, %s141_s9 }
  0x1b   :  { %73 = vrot.lane.b32.xlu2 %v112_v11, %s142_s12 }
  0x22   :  { %79 = vrot.lane.b32.xlu0 %v113_v12, %s143_s17  ;;  %85 = vrot.lane.b32.xlu1 %v114_v13, %s144_s18 }
  0x23   :  { %91 = vrot.lane.b32.xlu2 %v115_v14, %s145_s21 }
  0x5d   :  { %v32_v16 = vpop.permute.xlu2 %31  }
  0x65   :  { %v38_v17 = vpop.permute.xlu2 %37  }
  0x6d   :  { %v56_v18 = vpop.permute.xlu2 %55  }
  0x74   :  { %v8_v19 = vpop.permute.xlu0 %7   ;;  %v20_v20 = vpop.permute.xlu1 %19  }
  0x75   :  { %10 = vst.msk [vmem:[#allocation0] sm:$0x1] %vm9_vm1, %v8_v19   ;;  %v74_v21 = vpop.permute.xlu2 %73  }
  0x7c   :  { %v14_v22 = vpop.permute.xlu0 %13   ;;  %v26_v23 = vpop.permute.xlu1 %25  }
  0x7d   :  { %16 = vst.msk [vmem:[#allocation0] sm:$0x1] %vm15_vm2, %v14_v22   ;;  %v92_v24 = vpop.permute.xlu2 %91  }
  0x7e   :  { %22 = vst.msk [vmem:[#allocation0] sm:$0x1] %vm21_vm3, %v20_v20  }
  0x7f   :  { %28 = vst.msk [vmem:[#allocation0] sm:$0x1] %vm27_vm4, %v26_v23  }
  0x80   :  { %34 = vst.msk [vmem:[#allocation0] sm:$0x1] %vm33_vm5, %v32_v16  }
  0x81   :  { %40 = vst.msk [vmem:[#allocation0] sm:$0x1] %vm39_vm6, %v38_v17  }
  0x84   :  { %v44_v25 = vpop.permute.xlu0 %43   ;;  %v50_v26 = vpop.permute.xlu1 %49  }
  0x85   :  { %46 = vst.msk [vmem:[#allocation0] sm:$0x1] %vm45_vm7, %v44_v25  }
  0x86   :  { %52 = vst.msk [vmem:[#allocation0] sm:$0x1] %vm51_vm8, %v50_v26  }
  0x87   :  { %58 = vst.msk [vmem:[#allocation0] sm:$0x1] %vm57_vm9, %v56_v18  }
  0x8c   :  { %v62_v27 = vpop.permute.xlu0 %61   ;;  %v68_v28 = vpop.permute.xlu1 %67  }
  0x8d   :  { %64 = vst.msk [vmem:[#allocation0] sm:$0x1] %vm63_vm10, %v62_v27  }
  0x8e   :  { %70 = vst.msk [vmem:[#allocation0] sm:$0x1] %vm69_vm11, %v68_v28  }
  0x8f   :  { %76 = vst.msk [vmem:[#allocation0] sm:$0x1] %vm75_vm12, %v74_v21  }
  0x94   :  { %v80_v29 = vpop.permute.xlu0 %79   ;;  %v86_v30 = vpop.permute.xlu1 %85  }
  0x95   :  { %82 = vst.msk [vmem:[#allocation0] sm:$0x1] %vm81_vm13, %v80_v29  }
  0x96   :  { %88 = vst.msk [vmem:[#allocation0] sm:$0x1] %vm87_vm14, %v86_v30  }
  0x97   :  { %94 = vst.msk [vmem:[#allocation0] sm:$0x1] %vm93_vm15, %v92_v24  }
  0x9e   :  { %v97_v31 = vld [vmem:[#allocation0] sm:$0x1] }
  0x9f   :  { %100 = vst [vmem:[%s208_s1] sm:$0x1] %v97_v31 }

// kernel: _lambda_.3
= control target key start
LH: loop header
LB: loop body
LE: loop exit
PB: predicated region body
PF: predicated region fallthrough
CT: control target
= control target key end

     0   :  { %s499_s12 = smov 0   ;;  %s609_s0 = inlined_call_operand.vmem [shape: f32[2,16,64], index: 0, kind: input, shape index: {}]   ;;  %s610_s1 = inlined_call_operand.vmem [shape: f32[3,64,128], index: 1, kind: input, shape index: {}]   ;;  %s611_s2 = inlined_call_operand.vmem [shape: f32[2,16,128], index: 2, kind: output, shape index: {0}]   ;;  %s612_s3 = inlined_call_operand.vmem [shape: f32[2,2,128], index: 3, kind: output, shape index: {1}]  }
   0x1 LB: > { %s417_s13 = sadd.s32 4294967295, %s476_s12   ;;  %p421_p0 = scmp.ge.s32.totalorder %s476_s12, 1  ;;  %s476_s12 = sphi %s499_s12, %s14_s12  }
   0x2   : > { %p140_p1 = scmp.lt.s32.totalorder %s476_s12, 3 }
   0x4   : > { %p141_p2 = pnand %p421_p0, %p140_p1 }
   0x5   : > { %p168_p3 = scmp.lt.s32.totalorder (!%p141_p2), %s417_s13, 1 }
   0x6   : > { %144 = sbr.rel (%p141_p2) target bundleno = 187 (0xbb), region = 28 }
   0xb   : > { %v446_v0 = vld [vmem:[%s610_s1 + $0xb8] sm:$0xff]  ;;  %v445_v1 = vld [vmem:[%s610_s1 + $0xb0] sm:$0xff]  ;;  %vm184_vm0 = vcmask 516096   ;;  %v444_v5 = vld [vmem:[%s610_s1 + $0xa8] sm:$0xff]  ;;  %s614_s13 = smov (!%p168_p3, %s417_s13), 1  ;;  %v478_v8 = vmov 0.0  }
   0xc   : > { %v434_v2 = vld [vmem:[%s610_s1 + $0x78] sm:$0xff]  ;;  %294 = vmatpush.msra.mxu2 %v446_v0  ;;  %v433_v4 = vld [vmem:[%s610_s1 + $0x70] sm:$0xff]  ;;  %v432_v7 = vld [vmem:[%s610_s1 + $0x68] sm:$0xff]  ;;  %185 = vst.msk [vmem:[#allocation2] sm:$0x1] %vm184_vm0, %v478_v8  ;;  %s451_s9 = sshll.u32 %s614_s13, 4 }
   0xd   : > { %225 = vmatpush.msra.mxu0 %v434_v2  ;;  %v199_v3 = vld [vmem:[%s610_s1 + $0x38] sm:$0xff]  ;;  %453 = vmatpush.msra.mxu3 %v434_v2  ;;  %v198_v6 = vld [vmem:[%s610_s1 + $0x30] sm:$0xff]  ;;  %v197_v9 = vld [vmem:[%s610_s1 + $0x28] sm:$0xff]  ;;  %186 = vst.msk [vmem:[#allocation2 + $0x11] sm:$0x1] %vm184_vm0, %v478_v8  ;;  %vm187_vm1 = vcmask 523264   ;;  %s172_s16 = scalar_lea.vmem %s609_s0, %s451_s9  ;;  %s177_s19 = scalar_lea.vmem %s611_s2, %s451_s9 }
   0xe   : > { %254 = vmatpush.msra.mxu1 %v199_v3  ;;  %295 = vmatpush.msra.mxu2 %v445_v1  ;;  %v443_v10 = vld [vmem:[%s610_s1 + $0xa0] sm:$0xff]  ;;  %v442_v13 = vld [vmem:[%s610_s1 + $0x98] sm:$0xff]  ;;  %v183_v17 = vld [vmem:[%s172_s16 + $0x8] sm:$0xff]  ;;  %s426_s9 = sshll.u32 %s614_s13, 1 }
   0xf   : > { %226 = vmatpush.msra.mxu0 %v433_v4  ;;  %454 = vmatpush.msra.mxu3 %v433_v4  ;;  %v431_v11 = vld [vmem:[%s610_s1 + $0x60] sm:$0xff]  ;;  %v430_v14 = vld [vmem:[%s610_s1 + $0x58] sm:$0xff]  ;;  %v441_v18 = vld [vmem:[%s610_s1 + $0x90] sm:$0xff]  ;;  %189 = vst.msk [vmem:[#allocation2 + $0x9] sm:$0xff] %vm187_vm1, %v183_v17  ;;  %s181_s22 = scalar_lea.vmem %s612_s3, %s426_s9 }
  0x10   : > { %255 = vmatpush.msra.mxu1 %v198_v6  ;;  %296 = vmatpush.msra.mxu2 %v444_v5  ;;  %v196_v12 = vld [vmem:[%s610_s1 + $0x20] sm:$0xff]  ;;  %v195_v16 = vld [vmem:[%s610_s1 + $0x18] sm:$0xff]  ;;  %v429_v19 = vld [vmem:[%s610_s1 + $0x50] sm:$0xff] }
  0x11   : > { %227 = vmatpush.msra.mxu0 %v432_v7  ;;  %455 = vmatpush.msra.mxu3 %v432_v7  ;;  %v182_v15 = vld [vmem:[%s172_s16] sm:$0xff]  ;;  %v194_v20 = vld [vmem:[%s610_s1 + $0x10] sm:$0xff]  ;;  %v440_v21 = vld [vmem:[%s610_s1 + $0x88] sm:$0xff] }
  0x12   : > { %256 = vmatpush.msra.mxu1 %v197_v9  ;;  %297 = vmatpush.msra.mxu2 %v443_v10  ;;  %188 = vst.msk [vmem:[#allocation2 + $0x1] sm:$0xff] %vm187_vm1, %v182_v15  ;;  %v428_v22 = vld [vmem:[%s610_s1 + $0x48] sm:$0xff]  ;;  %v439_v24 = vld [vmem:[%s610_s1 + $0x80] sm:$0xff] }
  0x13   : > { %228 = vmatpush.msra.mxu0 %v431_v11  ;;  %456 = vmatpush.msra.mxu3 %v431_v11  ;;  %v193_v23 = vld [vmem:[%s610_s1 + $0x8] sm:$0xff]  ;;  %v427_v25 = vld [vmem:[%s610_s1 + $0x40] sm:$0xff] }
  0x14   : > { %257 = vmatpush.msra.mxu1 %v196_v12  ;;  %298 = vmatpush.msra.mxu2 %v442_v13  ;;  %v192_v26 = vld [vmem:[%s610_s1] sm:$0xff] }
  0x15   : > { %229 = vmatpush.msra.mxu0 %v430_v14  ;;  %457 = vmatpush.msra.mxu3 %v430_v14 }
  0x16   : > { %258 = vmatpush.msra.mxu1 %v195_v16  ;;  %299 = vmatpush.msra.mxu2 %v441_v18  ;;  %v201_v30 = vld [vmem:[#allocation2 + $0x9] sm:$0xff] }
  0x17   : > { %230 = vmatpush.msra.mxu0 %v429_v19  ;;  %458 = vmatpush.msra.mxu3 %v429_v19  ;;  %v270_v31 = vld [vmem:[#allocation2 + $0xa] sm:$0xff] }
  0x18   : > { %259 = vmatpush.msra.mxu1 %v194_v20  ;;  %300 = vmatpush.msra.mxu2 %v440_v21 }
  0x19   : > { %231 = vmatpush.msra.mxu0 %v428_v22  ;;  %459 = vmatpush.msra.mxu3 %v428_v22  ;;  %v200_v27 = vld [vmem:[#allocation2 + $0x1] sm:$0xff] }
  0x1a   : > { %260 = vmatpush.msra.mxu1 %v193_v23  ;;  %v190_v28 = vld [vmem:[#allocation2] sm:$0xff]  ;;  %301 = vmatpush.msra.mxu2 %v439_v24  ;;  %v191_v32 = vld [vmem:[#allocation2 + $0x8] sm:$0xff] }
  0x1b   : > { %v269_v29 = vld [vmem:[#allocation2 + $0x2] sm:$0xff]  ;;  %232 = vmatpush.msra.mxu0 %v427_v25  ;;  %460 = vmatpush.msra.mxu3 %v427_v25 }
  0x1c   : > { %447 = vmatmul.msk.f32.vlgmr.msra.gmra.mxu2 %vm187_vm1, %v269_v29  ;;  %261 = vmatpush.msra.mxu1 %v192_v26 }
  0x1d   : > { %435 = vmatmul.msk.f32.vlgmr.msra.gmra.mxu0 %vm187_vm1, %v200_v27  ;;  %437 = vmatmul.msk.f32.vlgmr.msra.gmra.mxu1 %vm187_vm1, %v190_v28 }
  0x1e   : > { %436 = vmatmul.msk.f32.vlgmr.msra.gmra.mxu3 %vm187_vm1, %v201_v30 }
  0x24   : > { %448 = vmatmul.msk.f32.gmra.mxu2 %vm187_vm1, %v270_v31 }
  0x25   : > { %438 = vmatmul.msk.f32.gmra.mxu1 %vm187_vm1, %v191_v32 }
  0x9a   : > { %v234_v33 = vpop.f32.mrf.mxu0  ;;  %v263_v34 = vpop.f32.mrf.mxu1 }
  0x9b   : > { %v264_v35 = vadd.f32 %v263_v34, %v234_v33 }
  0x9f   : > { %v303_v36 = vpop.f32.mrf.mxu2 }
  0xa0   : > { %v309_v37 = vadd.f32 %v303_v36, %v264_v35 }
  0xa1   : > { %v237_v38 = vpop.f32.mrf.mxu3 }
  0xa2   : > { %311 = vst [vmem:[%s177_s19] sm:$0xff] %v309_v37  ;;  %v266_v39 = vpop.f32.mrf.mxu1  ;;  %v321_v43 = vmul.f32 %v309_v37, %v309_v37 }
  0xa3   : > { %v267_v40 = vadd.f32 %v266_v39, %v237_v38 }
  0xa7   : > { %v306_v41 = vpop.f32.mrf.mxu2 }
  0xa8   : > { %v310_v42 = vadd.f32 %v306_v41, %v267_v40 }
  0xaa   : > { %312 = vst [vmem:[%s177_s19 + $0x8] sm:$0xff] %v310_v42  ;;  %v313_v44 = vadd.f32 %v310_v42, %v309_v37  ;;  %v322_v45 = vmul.f32 %v310_v42, %v310_v42 }
  0xac   : > { %v314_v46 = vrot.slane %v313_v44, 4  ;;  %v323_v47 = vadd.f32 %v322_v45, %v321_v43 }
  0xae   : > { %v315_v48 = vadd.f32 %v314_v46, %v313_v44  ;;  %v324_v49 = vrot.slane %v323_v47, 4 }
  0xb0   : > { %v316_v50 = vrot.slane %v315_v48, 2  ;;  %v325_v51 = vadd.f32 %v324_v49, %v323_v47 }
  0xb2   : > { %v317_v52 = vadd.f32 %v316_v50, %v315_v48  ;;  %v326_v53 = vrot.slane %v325_v51, 2 }
  0xb4   : > { %v318_v54 = vrot.slane %v317_v52, 1  ;;  %v327_v55 = vadd.f32 %v326_v53, %v325_v51 }
  0xb6   : > { %v319_v56 = vadd.f32 %v318_v54, %v317_v52  ;;  %v328_v57 = vrot.slane %v327_v55, 1 }
  0xb8   : > { %320 = vst [vmem:[%s181_s22] sm:$0x1] %v319_v56  ;;  %v329_v58 = vadd.f32 %v328_v57, %v327_v55 }
  0xba   : > { %330 = vst [vmem:[%s181_s22 + $0x1] sm:$0x1] %v329_v58 }
  0xbb PF: > { %s14_s12 = sadd.s32 1, %s476_s12  }
  0xbc   : > { %p11_p4 = scmp.ge.s32.totalorder %s14_s12, 4  }
  0xbe   :  { %13 = sbr.rel (!%p11_p4) target bundleno = 1 (0x1), region = 72 }

// kernel: _lambda_.4
= control target key start
LH: loop header
LB: loop body
LE: loop exit
PB: predicated region body
PF: predicated region fallthrough
CT: control target
= control target key end

     0   :  { %s601_s18 = smov 0   ;;  %s785_s0 = inlined_call_operand.vmem [shape: f32[2,16,128], index: 0, kind: input, shape index: {}]   ;;  %s786_s1 = inlined_call_operand.vmem [shape: f32[1,128], index: 1, kind: input, shape index: {}]   ;;  %s787_s2 = inlined_call_operand.vmem [shape: f32[1,128], index: 2, kind: input, shape index: {}]   ;;  %s788_s3 = inlined_call_operand.vmem [shape: f32[3,128,128], index: 3, kind: input, shape index: {}]   ;;  %s789_s4 = inlined_call_operand.vmem [shape: f32[2,16,128], index: 4, kind: output, shape index: {0}]   ;;  %s790_s5 = inlined_call_operand.vmem [shape: f32[2,2,128], index: 5, kind: output, shape index: {1}]  }
   0x1 LB: > { %s489_s19 = sadd.s32 4294967295, %s568_s18   ;;  %p493_p0 = scmp.ge.s32.totalorder %s568_s18, 1  ;;  %s568_s18 = sphi %s601_s18, %s16_s18  }
   0x2   : > { %p190_p1 = scmp.lt.s32.totalorder %s568_s18, 3 }
   0x4   : > { %p191_p2 = pnand %p493_p0, %p190_p1 }
   0x5   : > { %p618_p3 = scmp.lt.s32.totalorder (!%p191_p2), %s489_s19, 1 }
   0x6   : > { %194 = sbr.rel (%p191_p2) target bundleno = 202 (0xca), region = 36 }
   0xb   : > { %v530_v0 = vld [vmem:[%s788_s3 + $0x178] sm:$0xff]  ;;  %v529_v1 = vld [vmem:[%s788_s3 + $0x170] sm:$0xff]  ;;  %v570_v5 = vmov 0.0   ;;  %v528_v6 = vld [vmem:[%s788_s3 + $0x168] sm:$0xff]  ;;  %s793_s19 = smov (!%p618_p3, %s489_s19), 1 }
   0xc   : > { %v514_v2 = vld [vmem:[%s788_s3 + $0xf8] sm:$0xff]  ;;  %358 = vmatpush.msra.mxu2 %v530_v0  ;;  %v513_v4 = vld [vmem:[%s788_s3 + $0xf0] sm:$0xff]  ;;  %252 = vst [vmem:[#allocation2] sm:$0x1] %v570_v5  ;;  %v512_v8 = vld [vmem:[%s788_s3 + $0xe8] sm:$0xff]  ;;  %s533_s7 = sshll.u32 %s793_s19, 4 }
   0xd   : > { %293 = vmatpush.msra.mxu0 %v514_v2  ;;  %v273_v3 = vld [vmem:[%s788_s3 + $0x78] sm:$0xff]  ;;  %535 = vmatpush.msra.mxu3 %v514_v2  ;;  %v272_v7 = vld [vmem:[%s788_s3 + $0x70] sm:$0xff]  ;;  %253 = vst [vmem:[#allocation2 + $0x11] sm:$0x1] %v570_v5  ;;  %v271_v9 = vld [vmem:[%s788_s3 + $0x68] sm:$0xff]  ;;  %s226_s20 = scalar_lea.vmem %s785_s0, %s533_s7  ;;  %s231_s13 = scalar_lea.vmem %s789_s4, %s533_s7 }
   0xe   : > { %316 = vmatpush.msra.mxu1 %v273_v3  ;;  %359 = vmatpush.msra.mxu2 %v529_v1  ;;  %v527_v10 = vld [vmem:[%s788_s3 + $0x160] sm:$0xff]  ;;  %v526_v13 = vld [vmem:[%s788_s3 + $0x158] sm:$0xff]  ;;  %v525_v16 = vld [vmem:[%s788_s3 + $0x150] sm:$0xff]  ;;  %s498_s7 = sshll.u32 %s793_s19, 1 }
   0xf   : > { %294 = vmatpush.msra.mxu0 %v513_v4  ;;  %536 = vmatpush.msra.mxu3 %v513_v4  ;;  %v511_v11 = vld [vmem:[%s788_s3 + $0xe0] sm:$0xff]  ;;  %v510_v14 = vld [vmem:[%s788_s3 + $0xd8] sm:$0xff]  ;;  %v509_v17 = vld [vmem:[%s788_s3 + $0xd0] sm:$0xff]  ;;  %s235_s16 = scalar_lea.vmem %s790_s5, %s498_s7 }
  0x10   : > { %317 = vmatpush.msra.mxu1 %v272_v7  ;;  %360 = vmatpush.msra.mxu2 %v528_v6  ;;  %v270_v12 = vld [vmem:[%s788_s3 + $0x60] sm:$0xff]  ;;  %v269_v15 = vld [vmem:[%s788_s3 + $0x58] sm:$0xff]  ;;  %v268_v18 = vld [vmem:[%s788_s3 + $0x50] sm:$0xff] }
  0x11   : > { %295 = vmatpush.msra.mxu0 %v512_v8  ;;  %537 = vmatpush.msra.mxu3 %v512_v8  ;;  %v524_v19 = vld [vmem:[%s788_s3 + $0x148] sm:$0xff]  ;;  %v523_v22 = vld [vmem:[%s788_s3 + $0x140] sm:$0xff]  ;;  %v522_v24 = vld [vmem:[%s788_s3 + $0x138] sm:$0xff] }
  0x12   : > { %318 = vmatpush.msra.mxu1 %v271_v9  ;;  %361 = vmatpush.msra.mxu2 %v527_v10  ;;  %v508_v20 = vld [vmem:[%s788_s3 + $0xc8] sm:$0xff]  ;;  %v507_v23 = vld [vmem:[%s788_s3 + $0xc0] sm:$0xff]  ;;  %v521_v26 = vld [vmem:[%s788_s3 + $0x130] sm:$0xff] }
  0x13   : > { %296 = vmatpush.msra.mxu0 %v511_v11  ;;  %538 = vmatpush.msra.mxu3 %v511_v11  ;;  %v267_v21 = vld [vmem:[%s788_s3 + $0x48] sm:$0xff]  ;;  %v266_v25 = vld [vmem:[%s788_s3 + $0x40] sm:$0xff]  ;;  %v506_v27 = vld [vmem:[%s788_s3 + $0xb8] sm:$0xff] }
  0x14   : > { %319 = vmatpush.msra.mxu1 %v270_v12  ;;  %362 = vmatpush.msra.mxu2 %v526_v13  ;;  %v265_v28 = vld [vmem:[%s788_s3 + $0x38] sm:$0xff]  ;;  %v236_v29 = vld [vmem:[%s226_s20] sm:$0xff]  ;;  %v237_v30 = vld [vmem:[%s226_s20 + $0x8] sm:$0xff] }
  0x15   : > { %297 = vmatpush.msra.mxu0 %v510_v14  ;;  %539 = vmatpush.msra.mxu3 %v510_v14  ;;  %v560_v31 = vld [vmem:[%s786_s1] ss:$0 sm:$0xff]  ;;  %v505_v32 = vld [vmem:[%s788_s3 + $0xb0] sm:$0xff]  ;;  %v520_v37 = vld [vmem:[%s788_s3 + $0x128] sm:$0xff] }
  0x16   : > { %320 = vmatpush.msra.mxu1 %v269_v15  ;;  %363 = vmatpush.msra.mxu2 %v525_v16  ;;  %v561_v33 = vld [vmem:[%s787_s2] ss:$0 sm:$0xff]  ;;  %v264_v34 = vld [vmem:[%s788_s3 + $0x30] sm:$0xff]  ;;  %v242_v35 = vmul.f32 %v560_v31, %v236_v29  ;;  %v243_v36 = vmul.f32 %v560_v31, %v237_v30  ;;  %v504_v38 = vld [vmem:[%s788_s3 + $0xa8] sm:$0xff] }
  0x17   : > { %298 = vmatpush.msra.mxu0 %v509_v17  ;;  %540 = vmatpush.msra.mxu3 %v509_v17  ;;  %v263_v39 = vld [vmem:[%s788_s3 + $0x28] sm:$0xff]  ;;  %v519_v42 = vld [vmem:[%s788_s3 + $0x120] sm:$0xff]  ;;  %v518_v47 = vld [vmem:[%s788_s3 + $0x118] sm:$0xff] }
  0x18   : > { %321 = vmatpush.msra.mxu1 %v268_v18  ;;  %364 = vmatpush.msra.mxu2 %v524_v19  ;;  %v248_v40 = vadd.f32 %v561_v33, %v242_v35  ;;  %v249_v41 = vadd.f32 %v561_v33, %v243_v36  ;;  %v503_v43 = vld [vmem:[%s788_s3 + $0xa0] sm:$0xff]  ;;  %v502_v48 = vld [vmem:[%s788_s3 + $0x98] sm:$0xff]  ;;  %v517_v50 = vld [vmem:[%s788_s3 + $0x110] sm:$0xff] }
  0x19   : > { %299 = vmatpush.msra.mxu0 %v508_v20  ;;  %541 = vmatpush.msra.mxu3 %v508_v20  ;;  %v262_v44 = vld [vmem:[%s788_s3 + $0x20] sm:$0xff]  ;;  %v261_v49 = vld [vmem:[%s788_s3 + $0x18] sm:$0xff]  ;;  %v501_v51 = vld [vmem:[%s788_s3 + $0x90] sm:$0xff] }
  0x1a   : > { %322 = vmatpush.msra.mxu1 %v267_v21  ;;  %365 = vmatpush.msra.mxu2 %v523_v22  ;;  %v250_v45 = vmax.f32 %v248_v40, 0.0  ;;  %v251_v46 = vmax.f32 %v249_v41, 0.0  ;;  %v260_v52 = vld [vmem:[%s788_s3 + $0x10] sm:$0xff]  ;;  %v516_v53 = vld [vmem:[%s788_s3 + $0x108] sm:$0xff]  ;;  %v515_v56 = vld [vmem:[%s788_s3 + $0x100] sm:$0xff] }
  0x1b   : > { %300 = vmatpush.msra.mxu0 %v507_v23  ;;  %542 = vmatpush.msra.mxu3 %v507_v23  ;;  %v500_v54 = vld [vmem:[%s788_s3 + $0x88] sm:$0xff]  ;;  %v499_v57 = vld [vmem:[%s788_s3 + $0x80] sm:$0xff] }
  0x1c   : > { %323 = vmatpush.msra.mxu1 %v266_v25  ;;  %366 = vmatpush.msra.mxu2 %v522_v24  ;;  %254 = vst [vmem:[#allocation2 + $0x1] sm:$0xff] %v250_v45  ;;  %v259_v55 = vld [vmem:[%s788_s3 + $0x8] sm:$0xff]  ;;  %v258_v58 = vld [vmem:[%s788_s3] sm:$0xff] }
  0x1d   : > { %301 = vmatpush.msra.mxu0 %v506_v27  ;;  %543 = vmatpush.msra.mxu3 %v506_v27  ;;  %255 = vst [vmem:[#allocation2 + $0x9] sm:$0xff] %v251_v46 }
  0x1e   : > { %324 = vmatpush.msra.mxu1 %v265_v28  ;;  %367 = vmatpush.msra.mxu2 %v521_v26 }
  0x1f   : > { %302 = vmatpush.msra.mxu0 %v505_v32  ;;  %544 = vmatpush.msra.mxu3 %v505_v32 }
  0x20   : > { %325 = vmatpush.msra.mxu1 %v264_v34  ;;  %368 = vmatpush.msra.mxu2 %v520_v37 }
  0x21   : > { %303 = vmatpush.msra.mxu0 %v504_v38  ;;  %545 = vmatpush.msra.mxu3 %v504_v38 }
  0x22   : > { %326 = vmatpush.msra.mxu1 %v263_v39  ;;  %369 = vmatpush.msra.mxu2 %v519_v42 }
  0x23   : > { %304 = vmatpush.msra.mxu0 %v503_v43  ;;  %546 = vmatpush.msra.mxu3 %v503_v43  ;;  %v256_v59 = vld [vmem:[#allocation2] sm:$0xff] }
  0x24   : > { %327 = vmatpush.msra.mxu1 %v262_v44  ;;  %370 = vmatpush.msra.mxu2 %v518_v47  ;;  %v339_v60 = vld [vmem:[#allocation2 + $0x2] sm:$0xff]  ;;  %v340_v61 = vld [vmem:[#allocation2 + $0xa] sm:$0xff] }
  0x25   : > { %305 = vmatpush.msra.mxu0 %v502_v48  ;;  %547 = vmatpush.msra.mxu3 %v502_v48  ;;  %v257_v62 = vld [vmem:[#allocation2 + $0x8] sm:$0xff] }
  0x26   : > { %328 = vmatpush.msra.mxu1 %v261_v49  ;;  %371 = vmatpush.msra.mxu2 %v517_v50 }
  0x27   : > { %306 = vmatpush.msra.mxu0 %v501_v51  ;;  %548 = vmatpush.msra.mxu3 %v501_v51 }
  0x28   : > { %329 = vmatpush.msra.mxu1 %v260_v52  ;;  %372 = vmatpush.msra.mxu2 %v516_v53 }
  0x29   : > { %307 = vmatpush.msra.mxu0 %v500_v54  ;;  %549 = vmatpush.msra.mxu3 %v500_v54 }
  0x2a   : > { %330 = vmatpush.msra.mxu1 %v259_v55  ;;  %373 = vmatpush.msra.mxu2 %v515_v56 }
  0x2b   : > { %308 = vmatpush.msra.mxu0 %v499_v57  ;;  %374 = vmatmul.f32.vlgmr.msra.gmra.mxu2 %v339_v60 }
  0x2c   : > { %331 = vmatpush.msra.mxu1 %v258_v58  ;;  %309 = vmatmul.f32.vlgmr.msra.gmra.mxu0 %v250_v45 }
  0x2d   : > { %332 = vmatmul.f32.vlgmr.msra.gmra.mxu1 %v256_v59  ;;  %550 = vmatpush.msra.mxu3 %v499_v57 }
  0x2e   : > { %312 = vmatmul.f32.vlgmr.msra.gmra.mxu3 %v251_v46 }
  0x33   : > { %377 = vmatmul.f32.gmra.mxu2 %v340_v61 }
  0x35   : > { %335 = vmatmul.f32.gmra.mxu1 %v257_v62 }
  0xa9   : > { %v310_v63 = vpop.f32.mrf.mxu0 }
  0xaa   : > { %v333_v0 = vpop.f32.mrf.mxu1 }
  0xab   : > { %v334_v1 = vadd.f32 %v333_v0, %v310_v63 }
  0xae   : > { %v375_v2 = vpop.f32.mrf.mxu2 }
  0xaf   : > { %v381_v3 = vadd.f32 %v375_v2, %v334_v1 }
  0xb1   : > { %383 = vst [vmem:[%s231_s13] sm:$0xff] %v381_v3  ;;  %v313_v4 = vpop.f32.mrf.mxu3  ;;  %v393_v9 = vmul.f32 %v381_v3, %v381_v3 }
  0xb2   : > { %v336_v5 = vpop.f32.mrf.mxu1 }
  0xb3   : > { %v337_v6 = vadd.f32 %v336_v5, %v313_v4 }
  0xb6   : > { %v378_v7 = vpop.f32.mrf.mxu2 }
  0xb7   : > { %v382_v8 = vadd.f32 %v378_v7, %v337_v6 }
  0xb9   : > { %384 = vst [vmem:[%s231_s13 + $0x8] sm:$0xff] %v382_v8  ;;  %v385_v10 = vadd.f32 %v382_v8, %v381_v3  ;;  %v394_v11 = vmul.f32 %v382_v8, %v382_v8 }
  0xbb   : > { %v386_v12 = vrot.slane %v385_v10, 4  ;;  %v395_v13 = vadd.f32 %v394_v11, %v393_v9 }
  0xbd   : > { %v387_v14 = vadd.f32 %v386_v12, %v385_v10  ;;  %v396_v15 = vrot.slane %v395_v13, 4 }
  0xbf   : > { %v388_v16 = vrot.slane %v387_v14, 2  ;;  %v397_v17 = vadd.f32 %v396_v15, %v395_v13 }
  0xc1   : > { %v389_v18 = vadd.f32 %v388_v16, %v387_v14  ;;  %v398_v19 = vrot.slane %v397_v17, 2 }
  0xc3   : > { %v390_v20 = vrot.slane %v389_v18, 1  ;;  %v399_v21 = vadd.f32 %v398_v19, %v397_v17 }
  0xc5   : > { %v391_v22 = vadd.f32 %v390_v20, %v389_v18  ;;  %v400_v23 = vrot.slane %v399_v21, 1 }
  0xc7   : > { %392 = vst [vmem:[%s235_s16] sm:$0x1] %v391_v22  ;;  %v401_v24 = vadd.f32 %v400_v23, %v399_v21 }
  0xc9   : > { %402 = vst [vmem:[%s235_s16 + $0x1] sm:$0x1] %v401_v24 }
  0xca PF: > { %s16_s18 = sadd.s32 1, %s568_s18  }
  0xcb   : > { %p13_p4 = scmp.ge.s32.totalorder %s16_s18, 4  }
  0xcd   :  { %15 = sbr.rel (!%p13_p4) target bundleno = 1 (0x1), region = 80 }

// kernel: _lambda_.5
= control target key start
LH: loop header
LB: loop body
LE: loop exit
PB: predicated region body
PF: predicated region fallthrough
CT: control target
= control target key end

     0   :  { %s1025_s15 = smov 0   ;;  %s1367_s0 = inlined_call_operand.vmem [shape: f32[2,16,128], index: 0, kind: input, shape index: {}]   ;;  %s1368_s1 = inlined_call_operand.vmem [shape: f32[1,128], index: 1, kind: input, shape index: {}]   ;;  %s1369_s2 = inlined_call_operand.vmem [shape: f32[1,128], index: 2, kind: input, shape index: {}]   ;;  %s1370_s3 = inlined_call_operand.vmem [shape: f32[2,16,128], index: 3, kind: output, shape index: {0}]   ;;  %s1371_s4 = inlined_call_operand.vmem [shape: f32[2,8,64], index: 4, kind: output, shape index: {1}]  }
   0x1 LB: > { %s940_s16 = sadd.s32 4294967295, %s984_s15   ;;  %p944_p0 = scmp.ge.s32.totalorder %s984_s15, 1  ;;  %s984_s15 = sphi %s1025_s15, %s15_s15  }
   0x2   : > { %p165_p1 = scmp.lt.s32.totalorder %s984_s15, 3 }
   0x4   : > { %p166_p2 = pnand %p944_p0, %p165_p1 }
   0x5   : > { %p195_p3 = scmp.lt.s32.totalorder (!%p166_p2), %s940_s16, 1  ;;  %s986_s28 = smov (!%p166_p2), 112  }
   0x6   : > { %169 = sbr.rel (%p166_p2) target bundleno = 580 (0x244), region = 32  ;;  %s987_s29 = smov (!%p166_p2), 96  }
   0x7   : > { %s988_s30 = smov (!%p166_p2), 80   ;;  %s989_s5 = smov (!%p166_p2), 32  }
   0x8   : > { %s990_s6 = smov (!%p166_p2), 64   ;;  %s991_s7 = smov (!%p166_p2), 48  }
   0x9   : > { %s992_s8 = smov (!%p166_p2), 16   ;;  %s995_s9 = smov (!%p166_p2), 120  }
   0xa   : > { %s996_s10 = smov (!%p166_p2), 8   ;;  %s997_s11 = smov (!%p166_p2), 24  }
   0xb   : > { %s1373_s16 = smov (!%p195_p3, %s940_s16), 1  ;;  %v976_v0 = vld [vmem:[%s1368_s1] ss:$0 sm:$0xff]  ;;  %vm241_vm0 = vcmask 1041408   ;;  %vm419_vm1 = vcmask 1041409   ;;  %vm422_vm2 = vcmask 1042434  }
   0xc   : > { %s952_s19 = sshll.u32 %s1373_s16, 4  ;;  %v977_v1 = vld [vmem:[%s1369_s2] ss:$0 sm:$0xff]  ;;  %vm425_vm3 = vcmask 1043459   ;;  %vm428_vm4 = vcmask 1044484   ;;  %vm431_vm5 = vcmask 1045509  }
   0xd   : > { %s199_s22 = scalar_lea.vmem %s1367_s0, %s952_s19  ;;  %s204_s27 = scalar_lea.vmem %s1370_s3, %s952_s19  ;;  %vm434_vm6 = vcmask 1046534   ;;  %vm437_vm7 = vcmask 1047559   ;;  %vm546_vm8 = vcmask 1047556   ;;  %vm838_vm9 = vcmask 64512  }
   0xe   : > { %v210_v2 = vld [vmem:[%s199_s22 + $0x8] sm:$0xff]  ;;  %v209_v3 = vld [vmem:[%s199_s22] sm:$0xff]  ;;  %s998_s12 = smov 40   ;;  %s999_s13 = smov 56   ;;  %vm840_vm10 = vcmask 130048   ;;  %vm842_vm11 = vcmask 195584  }
   0xf   : > { %v216_v4 = vmul.f32 %v976_v0, %v210_v2  ;;  %v215_v5 = vmul.f32 %v976_v0, %v209_v3  ;;  %vm844_vm12 = vcmask 261120   ;;  %vm846_vm13 = vcmask 326656   ;;  %s949_s14 = sshll.u32 %s1373_s16, 3 }
  0x10   : > { %vm848_vm14 = vcmask 392192   ;;  %vm850_vm15 = vcmask 457728   ;;  %s208_s19 = scalar_lea.vmem %s1371_s4, %s949_s14 }
  0x11   : > { %v222_v6 = vadd.f32 %v977_v1, %v216_v4  ;;  %v221_v7 = vadd.f32 %v977_v1, %v215_v5 }
  0x13   : > { %v224_v8 = vmax.f32 %v222_v6, 0.0  ;;  %v223_v9 = vmax.f32 %v221_v7, 0.0 }
  0x15   : > { %v270_v10 = vsel %vm241_vm0, %v224_v8, -inf  ;;  %226 = vst [vmem:[%s204_s27 + $0x8] sm:$0xff] %v224_v8  ;;  %v242_v11 = vsel %vm241_vm0, %v223_v9, -inf  ;;  %v230_v12 = vrot.slane %v223_v9, 4  ;;  %v229_v13 = vrot.slane %v223_v9, 2 }
  0x16   : > { %v271_v14 = vrot.slane %v270_v10, 4  ;;  %v243_v15 = vrot.slane %v242_v11, 4  ;;  %225 = vst [vmem:[%s204_s27] sm:$0xff] %v223_v9  ;;  %v231_v16 = vrot.slane %v223_v9, 6  ;;  %v232_v17 = vrot.slane %v224_v8, 2 }
  0x17   : > { %v256_v18 = vsel %vm241_vm0, %v230_v12, -inf  ;;  %v249_v19 = vsel %vm241_vm0, %v229_v13, -inf  ;;  %v233_v20 = vrot.slane %v224_v8, 4  ;;  %v234_v21 = vrot.slane %v224_v8, 6 }
  0x18   : > { %v272_v22 = vmax.f32 %v270_v10, %v271_v14  ;;  %v244_v23 = vmax.f32 %v242_v11, %v243_v15  ;;  %v257_v24 = vrot.slane %v256_v18, 4  ;;  %v250_v25 = vrot.slane %v249_v19, 4 }
  0x19   : > { %v263_v26 = vsel %vm241_vm0, %v231_v16, -inf  ;;  %v277_v27 = vsel %vm241_vm0, %v232_v17, -inf  ;;  %v284_v28 = vsel %vm241_vm0, %v233_v20, -inf  ;;  %v291_v29 = vsel %vm241_vm0, %v234_v21, -inf }
  0x1a   : > { %v273_v30 = vrot.slane %v272_v22, 2  ;;  %v245_v31 = vrot.slane %v244_v23, 2  ;;  %v258_v32 = vmax.f32 %v256_v18, %v257_v24  ;;  %v251_v33 = vmax.f32 %v249_v19, %v250_v25 }
  0x1b   : > { %v264_v34 = vrot.slane %v263_v26, 4  ;;  %v278_v35 = vrot.slane %v277_v27, 4  ;;  %v285_v36 = vrot.slane %v284_v28, 4  ;;  %v292_v37 = vrot.slane %v291_v29, 4 }
  0x1c   : > { %v274_v38 = vmax.f32 %v272_v22, %v273_v30  ;;  %v246_v39 = vmax.f32 %v244_v23, %v245_v31  ;;  %v259_v40 = vrot.slane %v258_v32, 2  ;;  %v252_v41 = vrot.slane %v251_v33, 2 }
  0x1d   : > { %v265_v42 = vmax.f32 %v263_v26, %v264_v34  ;;  %v279_v43 = vmax.f32 %v277_v27, %v278_v35  ;;  %v286_v44 = vmax.f32 %v284_v28, %v285_v36  ;;  %v293_v53 = vmax.f32 %v291_v29, %v292_v37 }
  0x1e   : > { %v275_v45 = vrot.slane %v274_v38, 1  ;;  %v247_v46 = vrot.slane %v246_v39, 1  ;;  %v260_v47 = vmax.f32 %v258_v32, %v259_v40  ;;  %v253_v48 = vmax.f32 %v251_v33, %v252_v41 }
  0x1f   : > { %v266_v49 = vrot.slane %v265_v42, 2  ;;  %v280_v57 = vrot.slane %v279_v43, 2  ;;  %v287_v58 = vrot.slane %v286_v44, 2  ;;  %v294_v60 = vrot.slane %v293_v53, 2 }
  0x20   : > { %v1056_v50 = vmax.f32 %v274_v38, %v275_v45  ;;  %v1058_v51 = vmax.f32 %v246_v39, %v247_v46  ;;  %v261_v52 = vrot.slane %v260_v47, 1  ;;  %v254_v56 = vrot.slane %v253_v48, 1 }
  0x21   : > { %v267_v54 = vmax.f32 %v265_v42, %v266_v49  ;;  %v281_v62 = vmax.f32 %v279_v43, %v280_v57  ;;  %v288_v63 = vmax.f32 %v286_v44, %v287_v58  ;;  %v295_v1 = vmax.f32 %v293_v53, %v294_v60 }
  0x22   : > { %314 = vrot.lane.b32.xlu2 %v1056_v50, %s986_s28  ;;  %306 = vrot.lane.b32.xlu0 %v1058_v51, %s986_s28  ;;  %v1062_v55 = vmax.f32 %v260_v47, %v261_v52  ;;  %v1065_v61 = vmax.f32 %v253_v48, %v254_v56  ;;  %vm852_vm0 = vcmask 523264  }
  0x23   : > { %v268_v59 = vrot.slane %v267_v54, 1  ;;  %v282_v2 = vrot.slane %v281_v62, 1  ;;  %v289_v3 = vrot.slane %v288_v63, 1  ;;  %v296_v4 = vrot.slane %v295_v1, 1 }
  0x24   : > { %310 = vrot.lane.b32.xlu1 %v1062_v55, %s986_s28 }
  0x25   : > { %v1067_v0 = vmax.f32 %v267_v54, %v268_v59  ;;  %v1072_v5 = vmax.f32 %v281_v62, %v282_v2  ;;  %v1074_v6 = vmax.f32 %v288_v63, %v289_v3  ;;  %v1076_v7 = vmax.f32 %v295_v1, %v296_v4 }
  0x2a   : > { %322 = vrot.lane.b32.xlu2 %v1058_v51, %s987_s29  ;;  %308 = vrot.lane.b32.xlu0 %v1065_v61, %s986_s28 }
  0x2c   : > { %312 = vrot.lane.b32.xlu1 %v1067_v0, %s986_s28 }
  0x32   : > { %316 = vrot.lane.b32.xlu2 %v1072_v5, %s986_s28  ;;  %318 = vrot.lane.b32.xlu0 %v1074_v6, %s986_s28 }
  0x34   : > { %320 = vrot.lane.b32.xlu1 %v1076_v7, %s986_s28 }
  0x3a   : > { %328 = vrot.lane.b32.xlu2 %v1067_v0, %s987_s29  ;;  %324 = vrot.lane.b32.xlu0 %v1065_v61, %s987_s29 }
  0x3c   : > { %326 = vrot.lane.b32.xlu1 %v1062_v55, %s987_s29 }
  0x42   : > { %334 = vrot.lane.b32.xlu2 %v1074_v6, %s987_s29  ;;  %330 = vrot.lane.b32.xlu0 %v1056_v50, %s987_s29 }
  0x44   : > { %332 = vrot.lane.b32.xlu1 %v1072_v5, %s987_s29 }
  0x4a   : > { %340 = vrot.lane.b32.xlu2 %v1065_v61, %s988_s30  ;;  %336 = vrot.lane.b32.xlu0 %v1076_v7, %s987_s29 }
  0x4c   : > { %338 = vrot.lane.b32.xlu1 %v1058_v51, %s988_s30 }
  0x52   : > { %388 = vrot.lane.b32.xlu2 %v1065_v61, %s989_s5  ;;  %356 = vrot.lane.b32.xlu0 %v1065_v61, %s990_s6 }
  0x54   : > { %358 = vrot.lane.b32.xlu1 %v1062_v55, %s990_s6 }
  0x5a   : > { %360 = vrot.lane.b32.xlu2 %v1067_v0, %s990_s6  ;;  %342 = vrot.lane.b32.xlu0 %v1062_v55, %s988_s30 }
  0x5c   : > { %354 = vrot.lane.b32.xlu1 %v1058_v51, %s990_s6 }
  0x62   : > { %344 = vrot.lane.b32.xlu2 %v1067_v0, %s988_s30  ;;  %372 = vrot.lane.b32.xlu0 %v1065_v61, %s991_s7 }
  0x64   : > { %390 = vrot.lane.b32.xlu1 %v1062_v55, %s989_s5 }
  0x6a   : > { %386 = vrot.lane.b32.xlu2 %v1058_v51, %s989_s5  ;;  %362 = vrot.lane.b32.xlu0 %v1056_v50, %s990_s6 }
  0x6c   : > { %374 = vrot.lane.b32.xlu1 %v1062_v55, %s991_s7 }
  0x72   : > { %346 = vrot.lane.b32.xlu2 %v1056_v50, %s988_s30  ;;  %392 = vrot.lane.b32.xlu0 %v1067_v0, %s989_s5 }
  0x74   : > { %404 = vrot.lane.b32.xlu1 %v1065_v61, %s992_s8 }
  0x7a   : > { %376 = vrot.lane.b32.xlu2 %v1067_v0, %s991_s7  ;;  %364 = vrot.lane.b32.xlu0 %v1072_v5, %s990_s6 }
  0x7c   : > { %v315_v8 = vpop.permute.xlu2 %314  ;;  %370 = vrot.lane.b32.xlu1 %v1058_v51, %s991_s7 }
  0x7d   : > { %v445_v21 = vrot.slane %v315_v8, 4 }
  0x82   : > { %348 = vrot.lane.b32.xlu2 %v1072_v5, %s988_s30  ;;  %394 = vrot.lane.b32.xlu0 %v1056_v50, %s989_s5 }
  0x84   : > { %v323_v9 = vpop.permute.xlu2 %322  ;;  %406 = vrot.lane.b32.xlu1 %v1062_v55, %s992_s8 }
  0x8a   : > { %396 = vrot.lane.b32.xlu2 %v1072_v5, %s989_s5  ;;  %366 = vrot.lane.b32.xlu0 %v1074_v6, %s990_s6 }
  0x8c   : > { %v317_v10 = vpop.permute.xlu2 %316  ;;  %378 = vrot.lane.b32.xlu1 %v1056_v50, %s991_s7 }
  0x8d   : > { %v447_v18 = vrot.slane %v317_v10, 3 }
  0x92   : > { %350 = vrot.lane.b32.xlu2 %v1074_v6, %s988_s30  ;;  %402 = vrot.lane.b32.xlu0 %v1058_v51, %s992_s8 }
  0x94   : > { %v307_v11 = vpop.permute.xlu0 %306  ;;  %408 = vrot.lane.b32.xlu1 %v1067_v0, %s992_s8  ;;  %v329_v12 = vpop.permute.xlu2 %328 }
  0x95   : > { %v457_v36 = vrot.slane %v329_v12, 5 }
  0x96   : > { %v311_v13 = vpop.permute.xlu1 %310 }
  0x97   : > { %v441_v16 = vrot.slane %v311_v13, 6 }
  0x9a   : > { %368 = vrot.lane.b32.xlu0 %v1076_v7, %s990_s6  ;;  %398 = vrot.lane.b32.xlu2 %v1074_v6, %s989_s5 }
  0x9c   : > { %380 = vrot.lane.b32.xlu1 %v1072_v5, %s991_s7  ;;  %v309_v14 = vpop.permute.xlu0 %308  ;;  %v335_v22 = vpop.permute.xlu2 %334 }
  0x9d   : > { %v439_v15 = vrot.slane %v309_v14, 7  ;;  %v463_v45 = vrot.slane %v335_v22, 2 }
  0x9e   : > { %v313_v17 = vpop.permute.xlu1 %312 }
  0x9f   : > { %v440_v19 = vsel %vm419_vm1, %v439_v15, %v307_v11  ;;  %v443_v20 = vrot.slane %v313_v17, 5 }
  0xa0   : > { %v442_v23 = vsel %vm422_vm2, %v441_v16, %v440_v19 }
  0xa1   : > { %v444_v24 = vsel %vm425_vm3, %v443_v20, %v442_v23 }
  0xa2   : > { %v446_v25 = vsel %vm428_vm4, %v445_v21, %v444_v24  ;;  %410 = vrot.lane.b32.xlu0 %v1056_v50, %s992_s8  ;;  %382 = vrot.lane.b32.xlu2 %v1074_v6, %s991_s7 }
  0xa3   : > { %v448_v26 = vsel %vm431_vm5, %v447_v18, %v446_v25 }
  0xa4   : > { %352 = vrot.lane.b32.xlu1 %v1076_v7, %s988_s30  ;;  %v319_v27 = vpop.permute.xlu0 %318  ;;  %v341_v33 = vpop.permute.xlu2 %340 }
  0xa5   : > { %v449_v28 = vrot.slane %v319_v27, 2  ;;  %v467_v53 = vrot.slane %v341_v33, 7 }
  0xa6   : > { %v321_v29 = vpop.permute.xlu1 %320 }
  0xa7   : > { %v450_v30 = vsel %vm434_vm6, %v449_v28, %v448_v26  ;;  %v451_v31 = vrot.slane %v321_v29, 1 }
  0xa9   : > { %v1165_v32 = vsel %vm437_vm7, %v451_v31, %v450_v30 }
  0xaa   : > { %400 = vrot.lane.b32.xlu0 %v1076_v7, %s989_s5  ;;  %384 = vrot.lane.b32.xlu2 %v1076_v7, %s991_s7 }
  0xac   : > { %412 = vrot.lane.b32.xlu1 %v1072_v5, %s992_s8  ;;  %v325_v34 = vpop.permute.xlu0 %324  ;;  %v389_v42 = vpop.permute.xlu2 %388 }
  0xad   : > { %v453_v35 = vrot.slane %v325_v34, 7  ;;  %v509_v18 = vrot.slane %v389_v42, 7 }
  0xae   : > { %v327_v37 = vpop.permute.xlu1 %326 }
  0xaf   : > { %v454_v38 = vsel %vm419_vm1, %v453_v35, %v323_v9  ;;  %v455_v39 = vrot.slane %v327_v37, 6 }
  0xb1   : > { %v456_v40 = vsel %vm422_vm2, %v455_v39, %v454_v38 }
  0xb2   : > { %414 = vrot.lane.b32.xlu0 %v1074_v6, %s992_s8  ;;  %v458_v41 = vsel %vm425_vm3, %v457_v36, %v456_v40  ;;  %v418_v40 = vrot.slane %v1065_v61, 7  ;;  %v430_v61 = vrot.slane %v1072_v5, 3 }
  0xb4   : > { %416 = vrot.lane.b32.xlu1 %v1076_v7, %s992_s8  ;;  %v331_v43 = vpop.permute.xlu0 %330  ;;  %v361_v57 = vpop.permute.xlu2 %360 }
  0xb5   : > { %v459_v44 = vrot.slane %v331_v43, 4  ;;  %v485_v4 = vrot.slane %v361_v57, 5  ;;  %v421_v43 = vrot.slane %v1062_v55, 6  ;;  %v433_v55 = vrot.slane %v1074_v6, 2 }
  0xb6   : > { %v333_v46 = vpop.permute.xlu1 %332  ;;  %v436_v57 = vrot.slane %v1076_v7, 1 }
  0xb7   : > { %v460_v47 = vsel %vm428_vm4, %v459_v44, %v458_v41  ;;  %v461_v48 = vrot.slane %v333_v46, 3  ;;  %v420_v44 = vsel %vm419_vm1, %v418_v40, %v1058_v51 }
  0xb9   : > { %v462_v49 = vsel %vm431_vm5, %v461_v48, %v460_v47  ;;  %v423_v47 = vsel %vm422_vm2, %v421_v43, %v420_v44 }
  0xba   : > { %v464_v52 = vsel %vm434_vm6, %v463_v45, %v462_v49  ;;  %v424_v45 = vrot.slane %v1067_v0, 5  ;;  %v427_v49 = vrot.slane %v1056_v50, 4 }
  0xbc   : > { %v337_v54 = vpop.permute.xlu0 %336  ;;  %v345_v1 = vpop.permute.xlu2 %344 }
  0xbd   : > { %v465_v56 = vrot.slane %v337_v54, 1  ;;  %v471_v2 = vrot.slane %v345_v1, 5 }
  0xbe   : > { %v339_v58 = vpop.permute.xlu1 %338 }
  0xbf   : > { %v1184_v59 = vsel %vm437_vm7, %v465_v56, %v464_v52  ;;  %v468_v60 = vsel %vm419_vm1, %v467_v53, %v339_v58  ;;  %v426_v52 = vsel %vm425_vm3, %v424_v45, %v423_v47 }
  0xc0   : > { %v429_v54 = vsel %vm428_vm4, %v427_v49, %v426_v52  ;;  %v545_v6 = vrot.slane %v1184_v59, 4 }
  0xc1   : > { %v432_v51 = vsel %vm431_vm5, %v430_v61, %v429_v54 }
  0xc2   : > { %v435_v50 = vsel %vm434_vm6, %v433_v55, %v432_v51 }
  0xc4   : > { %v357_v62 = vpop.permute.xlu0 %356  ;;  %v387_v17 = vpop.permute.xlu2 %386 }
  0xc5   : > { %v481_v8 = vrot.slane %v357_v62, 7  ;;  %v510_v22 = vsel %vm419_vm1, %v509_v18, %v387_v17  ;;  %v993_v62 = vmov 1983009808  }
  0xc6   : > { %v359_v63 = vpop.permute.xlu1 %358 }
  0xc7   : > { %v483_v10 = vrot.slane %v359_v63, 6  ;;  %v551_v63 = vunpack.c.l.s4 %v993_v62 }
  0xcc   : > { %v343_v3 = vpop.permute.xlu0 %342  ;;  %v347_v24 = vpop.permute.xlu2 %346 }
  0xcd   : > { %v469_v9 = vrot.slane %v343_v3, 6 }
  0xce   : > { %v355_v11 = vpop.permute.xlu1 %354 }
  0xcf   : > { %v470_v12 = vsel %vm422_vm2, %v469_v9, %v468_v60  ;;  %v482_v13 = vsel %vm419_vm1, %v481_v8, %v355_v11  ;;  %v438_v60 = vsel %vm437_vm7, %v436_v57, %v435_v50 }
  0xd0   : > { %v1190_v14 = vsel %vm425_vm3, %v471_v2, %v470_v12  ;;  %v484_v15 = vsel %vm422_vm2, %v483_v10, %v482_v13  ;;  %v548_v2 = vrot.slane %v438_v60, 4  ;;  %v547_v9 = vsel %vm546_vm8, %v545_v6, %v438_v60 }
  0xd1   : > { %v486_v16 = vsel %vm425_vm3, %v485_v4, %v484_v15  ;;  %v1233_v4 = vunpack.c.0.s8 %v551_v63  ;;  %v473_v10 = vrot.slane %v347_v24, 4 }
  0xd2   : > { %v549_v7 = vsel %vm546_vm8, %v1184_v59, %v548_v2 }
  0xd3   : > { %v557_v13 = vperm.slane %v549_v7, %v1233_v4  ;;  %v553_v18 = vperm.slane %v547_v9, %v1233_v4  ;;  %v474_v59 = vsel %vm428_vm4, %v473_v10, %v1190_v14 }
  0xd4   : > { %v373_v19 = vpop.permute.xlu0 %372  ;;  %v1199_v30 = vpop.permute.xlu2 %376 }
  0xd5   : > { %v495_v34 = vrot.slane %v373_v19, 7 }
  0xd6   : > { %v391_v20 = vpop.permute.xlu1 %390 }
  0xd7   : > { %v511_v21 = vrot.slane %v391_v20, 6 }
  0xd9   : > { %v512_v23 = vsel %vm422_vm2, %v511_v21, %v510_v22 }
  0xdc   : > { %v363_v25 = vpop.permute.xlu0 %362  ;;  %v349_v38 = vpop.permute.xlu2 %348 }
  0xdd   : > { %v487_v26 = vrot.slane %v363_v25, 4  ;;  %v475_v12 = vrot.slane %v349_v38, 3 }
  0xde   : > { %v375_v27 = vpop.permute.xlu1 %374 }
  0xdf   : > { %v1197_v28 = vsel %vm428_vm4, %v487_v26, %v486_v16  ;;  %v497_v35 = vrot.slane %v375_v27, 6  ;;  %v560_v26 = vrot.slane %v1165_v32, 4  ;;  %v476_v27 = vsel %vm431_vm5, %v475_v12, %v474_v59 }
  0xe4   : > { %v393_v29 = vpop.permute.xlu0 %392  ;;  %v397_v46 = vpop.permute.xlu2 %396 }
  0xe5   : > { %v513_v8 = vrot.slane %v393_v29, 5  ;;  %v517_v19 = vrot.slane %v397_v46, 3 }
  0xe6   : > { %v1201_v31 = vpop.permute.xlu1 %404 }
  0xe7   : > { %v514_v20 = vsel %vm425_vm3, %v513_v8, %v512_v23 }
  0xec   : > { %v1203_v33 = vpop.permute.xlu0 %364  ;;  %v351_v56 = vpop.permute.xlu2 %350 }
  0xed   : > { %v477_v15 = vrot.slane %v351_v56, 2  ;;  %v489_v21 = vrot.slane %v1203_v33, 3  ;;  %v596_v33 = vrot.slane %v553_v18, 4 }
  0xee   : > { %v371_v36 = vpop.permute.xlu1 %370 }
  0xef   : > { %v496_v37 = vsel %vm419_vm1, %v495_v34, %v371_v36  ;;  %v499_v36 = vrot.slane %v1199_v30, 5  ;;  %v478_v23 = vsel %vm434_vm6, %v477_v15, %v476_v27  ;;  %v490_v14 = vsel %vm431_vm5, %v489_v21, %v1197_v28 }
  0xf0   : > { %v1207_v39 = vsel %vm422_vm2, %v497_v35, %v496_v37  ;;  %v608_v35 = vrot.slane %v557_v13, 4  ;;  %v523_v30 = vrot.slane %v1201_v31, 7  ;;  %v994_v15 = vmov 1934713408  }
  0xf1   : > { %v500_v28 = vsel %vm425_vm3, %v499_v36, %v1207_v39 }
  0xf4   : > { %v395_v41 = vpop.permute.xlu0 %394  ;;  %v399_v5 = vpop.permute.xlu2 %398 }
  0xf5   : > { %v515_v11 = vrot.slane %v395_v41, 4  ;;  %v519_v37 = vrot.slane %v399_v5, 2 }
  0xf6   : > { %v1210_v42 = vpop.permute.xlu1 %406 }
  0xf7   : > { %v516_v22 = vsel %vm428_vm4, %v515_v11, %v514_v20  ;;  %v525_v49 = vrot.slane %v1210_v42, 6 }
  0xf8   : > { %v518_v38 = vsel %vm431_vm5, %v517_v19, %v516_v22 }
  0xf9   : > { %v520_v52 = vsel %vm434_vm6, %v519_v37, %v518_v38 }
  0xfc   : > { %v367_v48 = vpop.permute.xlu0 %366  ;;  %v383_v16 = vpop.permute.xlu2 %382 }
  0xfd   : > { %v491_v24 = vrot.slane %v367_v48, 2  ;;  %v505_v57 = vrot.slane %v383_v16, 2  ;;  %v599_v16 = vunpack.c.l.s4 %v994_v15 }
  0xfe   : > { %v1219_v53 = vpop.permute.xlu1 %378 }
  0xff   : > { %v492_v41 = vsel %vm434_vm6, %v491_v24, %v490_v14  ;;  %v501_v43 = vrot.slane %v1219_v53, 4  ;;  %v1287_v59 = vunpack.c.0.s8 %v599_v16 }
 0x101   : > { %v502_v56 = vsel %vm428_vm4, %v501_v43, %v500_v28 }
 0x104   : > { %v1225_v0 = vpop.permute.xlu0 %402  ;;  %v385_v60 = vpop.permute.xlu2 %384 }
 0x105   : > { %v524_v5 = vsel %vm419_vm1, %v523_v30, %v1225_v0 }
 0x106   : > { %v1228_v58 = vpop.permute.xlu1 %408  ;;  %v526_v0 = vsel %vm422_vm2, %v525_v49, %v524_v5 }
 0x10c   : > { %v369_v1 = vpop.permute.xlu0 %368 }
 0x10d   : > { %v493_v29 = vrot.slane %v369_v1, 1  ;;  %v527_v1 = vrot.slane %v1228_v58, 5 }
 0x10e   : > { %v381_v3 = vpop.permute.xlu1 %380 }
 0x10f   : > { %v494_v46 = vsel %vm437_vm7, %v493_v29, %v492_v41  ;;  %v503_v47 = vrot.slane %v381_v3, 3  ;;  %v507_v3 = vrot.slane %v385_v60, 1  ;;  %v528_v58 = vsel %vm425_vm3, %v527_v1, %v526_v0 }
 0x110   : > { %v572_v50 = vrot.slane %v494_v46, 4 }
 0x111   : > { %v504_v42 = vsel %vm431_vm5, %v503_v47, %v502_v56 }
 0x112   : > { %v506_v10 = vsel %vm434_vm6, %v505_v57, %v504_v42 }
 0x113   : > { %v508_v20 = vsel %vm437_vm7, %v507_v3, %v506_v10 }
 0x114   : > { %v1239_v17 = vpop.permute.xlu0 %410 }
 0x115   : > { %v529_v7 = vrot.slane %v1239_v17, 4 }
 0x116   : > { %v353_v25 = vpop.permute.xlu1 %352 }
 0x117   : > { %v479_v34 = vrot.slane %v353_v25, 1  ;;  %v530_v17 = vsel %vm428_vm4, %v529_v7, %v528_v58 }
 0x119   : > { %v480_v40 = vsel %vm437_vm7, %v479_v34, %v478_v23 }
 0x11a   : > { %v558_v44 = vrot.slane %v480_v40, 4  ;;  %v561_v45 = vsel %vm546_vm8, %v480_v40, %v560_v26  ;;  %v584_v26 = vrot.slane %v508_v20, 4 }
 0x11b   : > { %v569_v48 = vperm.slane %v561_v45, %v1233_v4 }
 0x11c   : > { %v559_v53 = vsel %vm546_vm8, %v558_v44, %v1165_v32  ;;  %v401_v61 = vpop.permute.xlu0 %400 }
 0x11d   : > { %v565_v54 = vperm.slane %v559_v53, %v1233_v4  ;;  %v606_v55 = vrot.slane %v569_v48, 4  ;;  %v521_v31 = vrot.slane %v401_v61, 1  ;;  %v609_v51 = vsel %vm546_vm8, %v569_v48, %v608_v35 }
 0x11e   : > { %v413_v39 = vpop.permute.xlu1 %412  ;;  %v617_v36 = vperm.slane %v609_v51, %v1287_v59 }
 0x11f   : > { %v594_v62 = vrot.slane %v565_v54, 4  ;;  %v522_v63 = vsel %vm437_vm7, %v521_v31, %v520_v52  ;;  %v597_v32 = vsel %vm546_vm8, %v565_v54, %v596_v33  ;;  %v607_v9 = vsel %vm546_vm8, %v606_v55, %v557_v13 }
 0x120   : > { %v570_v2 = vrot.slane %v522_v63, 4  ;;  %v573_v6 = vsel %vm546_vm8, %v522_v63, %v572_v50  ;;  %v531_v12 = vrot.slane %v413_v39, 3  ;;  %v605_v33 = vperm.slane %v597_v32, %v1287_v59 }
 0x121   : > { %v595_v8 = vsel %vm546_vm8, %v594_v62, %v553_v18  ;;  %v581_v22 = vperm.slane %v573_v6, %v1233_v4  ;;  %v613_v40 = vperm.slane %v607_v9, %v1287_v59 }
 0x122   : > { %v571_v11 = vsel %vm546_vm8, %v570_v2, %v494_v46  ;;  %v532_v18 = vsel %vm431_vm5, %v531_v12, %v530_v17  ;;  %v601_v38 = vperm.slane %v595_v8, %v1287_v59  ;;  %v656_v46 = vrot.slane %v617_v36, 4 }
 0x123   : > { %v577_v27 = vperm.slane %v571_v11, %v1233_v4  ;;  %v632_v23 = vrot.slane %v581_v22, 4  ;;  %v648_v48 = vrot.slane %v605_v33, 4  ;;  %v652_v51 = vrot.slane %v613_v40, 4 }
 0x124   : > { %v415_v19 = vpop.permute.xlu0 %414  ;;  %v644_v31 = vrot.slane %v601_v38, 4 }
 0x125   : > { %v533_v21 = vrot.slane %v415_v19, 2  ;;  %v620_v45 = vrot.slane %v577_v27, 4 }
 0x126   : > { %v417_v13 = vpop.permute.xlu1 %416 }
 0x127   : > { %v534_v24 = vsel %vm434_vm6, %v533_v21, %v532_v18  ;;  %v535_v25 = vrot.slane %v417_v13, 1 }
 0x129   : > { %v536_v29 = vsel %vm437_vm7, %v535_v25, %v534_v24 }
 0x12a   : > { %v582_v34 = vrot.slane %v536_v29, 4  ;;  %v585_v35 = vsel %vm546_vm8, %v536_v29, %v584_v26 }
 0x12b   : > { %v593_v37 = vperm.slane %v585_v35, %v1233_v4 }
 0x12c   : > { %v583_v14 = vsel %vm546_vm8, %v582_v34, %v508_v20 }
 0x12d   : > { %v589_v41 = vperm.slane %v583_v14, %v1233_v4  ;;  %v630_v43 = vrot.slane %v593_v37, 4  ;;  %v633_v44 = vsel %vm546_vm8, %v593_v37, %v632_v23 }
 0x12e   : > { %v641_v30 = vperm.slane %v633_v44, %v1287_v59 }
 0x12f   : > { %v621_v47 = vsel %vm546_vm8, %v589_v41, %v620_v45  ;;  %v618_v28 = vrot.slane %v589_v41, 4  ;;  %v631_v49 = vsel %vm546_vm8, %v630_v43, %v581_v22 }
 0x130   : > { %v657_v52 = vsel %vm546_vm8, %v641_v30, %v656_v46  ;;  %v629_v53 = vperm.slane %v621_v47, %v1287_v59  ;;  %v654_v61 = vrot.slane %v641_v30, 4  ;;  %v637_v54 = vperm.slane %v631_v49, %v1287_v59 }
 0x131   : > { %680 = vrot.lane.b32.xlu0 %v657_v52, %s995_s9  ;;  %v619_v55 = vsel %vm546_vm8, %v618_v28, %v577_v27 }
 0x132   : > { %v649_v56 = vsel %vm546_vm8, %v629_v53, %v648_v48  ;;  %v625_v57 = vperm.slane %v619_v55, %v1287_v59  ;;  %v655_v50 = vsel %vm546_vm8, %v654_v61, %v617_v36  ;;  %v646_v60 = vrot.slane %v629_v53, 4 }
 0x133   : > { %672 = vrot.lane.b32.xlu2 %v649_v56, %s995_s9  ;;  %v650_v39 = vrot.slane %v637_v54, 4  ;;  %v653_v42 = vsel %vm546_vm8, %v637_v54, %v652_v51 }
 0x134   : > { %v645_v62 = vsel %vm546_vm8, %v625_v57, %v644_v31  ;;  %v647_v63 = vsel %vm546_vm8, %v646_v60, %v605_v33  ;;  %v642_v32 = vrot.slane %v625_v57, 4 }
 0x135   : > { %668 = vrot.lane.b32.xlu1 %v645_v62, %s995_s9  ;;  %v651_v5 = vsel %vm546_vm8, %v650_v39, %v613_v40 }
 0x136   : > { %v643_v1 = vsel %vm546_vm8, %v642_v32, %v601_v38 }
 0x139   : > { %678 = vrot.lane.b32.xlu0 %v655_v50, %s995_s9 }
 0x13b   : > { %670 = vrot.lane.b32.xlu2 %v647_v63, %s995_s9 }
 0x13d   : > { %674 = vrot.lane.b32.xlu1 %v651_v5, %s995_s9 }
 0x141   : > { %666 = vrot.lane.b32.xlu0 %v643_v1, %s995_s9 }
 0x143   : > { %676 = vrot.lane.b32.xlu2 %v653_v42, %s995_s9 }
 0x18d   : > { %v673_v2 = vpop.permute.xlu2 %672 }
 0x18e   : > { %v693_v11 = vmax.f32 %v649_v56, %v673_v2 }
 0x190   : > { %v710_v19 = vrot.slane %v693_v11, 4 }
 0x195   : > { %v671_v6 = vpop.permute.xlu2 %670 }
 0x196   : > { %v692_v13 = vmax.f32 %v647_v63, %v671_v6 }
 0x198   : > { %v698_v33 = vrot.slane %v692_v13, 4 }
 0x19d   : > { %v677_v8 = vpop.permute.xlu2 %676 }
 0x19e   : > { %v695_v12 = vmax.f32 %v653_v42, %v677_v8 }
 0x1a0   : > { %v736_v25 = vrot.slane %v695_v12, 4 }
 0x1a3   : > { %v681_v3 = vpop.permute.xlu0 %680 }
 0x1a4   : > { %v697_v7 = vmax.f32 %v657_v52, %v681_v3 }
 0x1a6   : > { %v734_v10 = vrot.slane %v697_v7, 4  ;;  %v737_v35 = vsel %vm546_vm8, %v697_v7, %v736_v25 }
 0x1a7   : > { %v669_v9 = vpop.permute.xlu1 %668  ;;  %v745_v44 = vperm.slane %v737_v35, %v1233_v4 }
 0x1a8   : > { %v691_v15 = vmax.f32 %v645_v62, %v669_v9  ;;  %v735_v0 = vsel %vm546_vm8, %v734_v10, %v695_v12 }
 0x1a9   : > { %v741_v17 = vperm.slane %v735_v0, %v1233_v4  ;;  %v782_v51 = vrot.slane %v745_v44, 4 }
 0x1aa   : > { %v712_v20 = vrot.slane %v691_v15, 4  ;;  %v711_v21 = vsel %vm546_vm8, %v710_v19, %v691_v15 }
 0x1ab   : > { %v679_v16 = vpop.permute.xlu0 %678  ;;  %v717_v27 = vperm.slane %v711_v21, %v1233_v4  ;;  %v770_v36 = vrot.slane %v741_v17, 4 }
 0x1ac   : > { %v696_v58 = vmax.f32 %v655_v50, %v679_v16  ;;  %v713_v26 = vsel %vm546_vm8, %v693_v11, %v712_v20 }
 0x1ad   : > { %v721_v40 = vperm.slane %v713_v26, %v1233_v4  ;;  %v746_v45 = vrot.slane %v717_v27, 4 }
 0x1ae   : > { %v722_v22 = vrot.slane %v696_v58, 4 }
 0x1af   : > { %v675_v18 = vpop.permute.xlu1 %674  ;;  %v758_v61 = vrot.slane %v721_v40, 4 }
 0x1b0   : > { %v694_v24 = vmax.f32 %v651_v5, %v675_v18 }
 0x1b2   : > { %v723_v29 = vsel %vm546_vm8, %v722_v22, %v694_v24  ;;  %v724_v34 = vrot.slane %v694_v24, 4 }
 0x1b3   : > { %v729_v23 = vperm.slane %v723_v29, %v1233_v4  ;;  %v667_v37 = vpop.permute.xlu0 %666 }
 0x1b4   : > { %v725_v14 = vsel %vm546_vm8, %v696_v58, %v724_v34  ;;  %v690_v38 = vmax.f32 %v643_v1, %v667_v37 }
 0x1b5   : > { %v772_v41 = vrot.slane %v729_v23, 4  ;;  %v771_v43 = vsel %vm546_vm8, %v770_v36, %v729_v23  ;;  %v733_v47 = vperm.slane %v725_v14, %v1233_v4 }
 0x1b6   : > { %v699_v30 = vsel %vm546_vm8, %v698_v33, %v690_v38  ;;  %v700_v46 = vrot.slane %v690_v38, 4  ;;  %v777_v49 = vperm.slane %v771_v43, %v1287_v59 }
 0x1b7   : > { %v705_v48 = vperm.slane %v699_v30, %v1233_v4  ;;  %v773_v28 = vsel %vm546_vm8, %v741_v17, %v772_v41  ;;  %v784_v57 = vrot.slane %v733_v47, 4  ;;  %v783_v5 = vsel %vm546_vm8, %v782_v51, %v733_v47 }
 0x1b8   : > { %v701_v52 = vsel %vm546_vm8, %v692_v13, %v700_v46  ;;  %v781_v53 = vperm.slane %v773_v28, %v1287_v59  ;;  %v794_v60 = vrot.slane %v777_v49, 4  ;;  %v789_v9 = vperm.slane %v783_v5, %v1287_v59 }
 0x1b9   : > { %v709_v54 = vperm.slane %v701_v52, %v1233_v4  ;;  %v748_v55 = vrot.slane %v705_v48, 4  ;;  %v747_v31 = vsel %vm546_vm8, %v746_v45, %v705_v48  ;;  %v785_v7 = vsel %vm546_vm8, %v745_v44, %v784_v57 }
 0x1ba   : > { %v753_v56 = vperm.slane %v747_v31, %v1287_v59  ;;  %v798_v62 = vrot.slane %v781_v53, 4  ;;  %v793_v12 = vperm.slane %v785_v7, %v1287_v59  ;;  %v802_v15 = vrot.slane %v789_v9, 4 }
 0x1bb   : > { %v749_v50 = vsel %vm546_vm8, %v717_v27, %v748_v55  ;;  %v759_v39 = vsel %vm546_vm8, %v758_v61, %v709_v54  ;;  %v760_v32 = vrot.slane %v709_v54, 4 }
 0x1bc   : > { %v757_v42 = vperm.slane %v749_v50, %v1287_v59  ;;  %v796_v63 = vrot.slane %v753_v56, 4  ;;  %v795_v4 = vsel %vm546_vm8, %v794_v60, %v753_v56  ;;  %v765_v3 = vperm.slane %v759_v39, %v1287_v59 }
 0x1bd   : > { %v761_v10 = vsel %vm546_vm8, %v721_v40, %v760_v32  ;;  %v806_v19 = vrot.slane %v793_v12, 4 }
 0x1be   : > { %v799_v1 = vsel %vm546_vm8, %v798_v62, %v757_v42  ;;  %v797_v2 = vsel %vm546_vm8, %v777_v49, %v796_v63  ;;  %v800_v6 = vrot.slane %v757_v42, 4  ;;  %v804_v11 = vrot.slane %v765_v3, 4 }
 0x1bf   : > { %815 = vrot.lane.b32.xlu2 %v799_v1, %s992_s8  ;;  %811 = vrot.lane.b32.xlu1 %v797_v2, %s996_s10  ;;  %v769_v16 = vperm.slane %v761_v10, %v1287_v59  ;;  %v803_v58 = vsel %vm546_vm8, %v802_v15, %v765_v3 }
 0x1c0   : > { %v801_v8 = vsel %vm546_vm8, %v781_v53, %v800_v6  ;;  %v805_v0 = vsel %vm546_vm8, %v789_v9, %v804_v11 }
 0x1c1   : > { %819 = vrot.lane.b32.xlu0 %v801_v8, %s997_s11  ;;  %v807_v20 = vsel %vm546_vm8, %v806_v19, %v769_v16  ;;  %v808_v17 = vrot.slane %v769_v16, 4 }
 0x1c3   : > { %v809_v21 = vsel %vm546_vm8, %v793_v12, %v808_v17 }
 0x1c7   : > { %827 = vrot.lane.b32.xlu2 %v805_v0, %s998_s12  ;;  %823 = vrot.lane.b32.xlu1 %v803_v58, %s989_s5 }
 0x1c9   : > { %831 = vrot.lane.b32.xlu0 %v807_v20, %s991_s7 }
 0x1cf   : > { %835 = vrot.lane.b32.xlu1 %v809_v21, %s999_s13 }
 0x219   : > { %v816_v18 = vpop.permute.xlu2 %815 }
 0x221   : > { %v828_v29 = vpop.permute.xlu2 %827 }
 0x231   : > { %v812_v59 = vpop.permute.xlu1 %811 }
 0x232   : > { %v839_v13 = vsel %vm838_vm9, %v795_v4, %v812_v59 }
 0x233   : > { %v820_v22 = vpop.permute.xlu0 %819  ;;  %v841_v24 = vsel %vm840_vm10, %v839_v13, %v816_v18 }
 0x234   : > { %v843_v26 = vsel %vm842_vm11, %v841_v24, %v820_v22 }
 0x239   : > { %v824_v25 = vpop.permute.xlu1 %823 }
 0x23a   : > { %v845_v27 = vsel %vm844_vm12, %v843_v26, %v824_v25 }
 0x23b   : > { %v832_v34 = vpop.permute.xlu0 %831  ;;  %v847_v35 = vsel %vm846_vm13, %v845_v27, %v828_v29 }
 0x23c   : > { %v849_v36 = vsel %vm848_vm14, %v847_v35, %v832_v34 }
 0x241   : > { %v836_v23 = vpop.permute.xlu1 %835 }
 0x242   : > { %v851_v37 = vsel %vm850_vm15, %v849_v36, %v836_v23 }
 0x243   : > { %853 = vst.msk [vmem:[%s208_s19] sm:$0xff] %vm852_vm0, %v851_v37 }
 0x244 PF: > { %s15_s15 = sadd.s32 1, %s984_s15  }
 0x245   : > { %p12_p4 = scmp.ge.s32.totalorder %s15_s15, 4  }
 0x247   :  { %14 = sbr.rel (!%p12_p4) target bundleno = 1 (0x1), region = 74 }

</bundles_post_ra>
